<compile_context>
chip_gen: v7x
topology: tpu7x:2x2x1
jax: 0.10.0
libtpu: 0.0.40
codegen_flags: <defaults>
</compile_context>

<pallas_src>
import functools

import jax
import jax.numpy as jnp
import numpy as np
from jax import lax
from jax.experimental import pallas as pl
from jax.experimental.pallas import tpu as pltpu

BETA = 0.5
THRESH = 1.0

LANE = 128
SUBLANE = 8

# Per-iteration VMEM tile budget (conservative: fits v7x's 64 MiB per-TC VMEM
# with headroom; well inside v5e/v6e's 128 MiB).
_VMEM_TILE_BUDGET = 40 * 1024 * 1024
_VMEM_LIMIT_BYTES = 48 * 1024 * 1024
_MAX_TIME_BLOCK = 64


def _round_up(x, m):
    return (x + m - 1) // m * m


def _pick_time_block(T, TB, Din, Hp, Op, budget_bytes):
    """Largest TS (<= min(T, 64)) whose double-buffered footprint fits."""

    def footprint(ts):
        # Double-buffered pipelined I/O blocks.
        io = ts * TB * (Din * 4            # x           (f32)
                        + Hp * 4 + Hp * 2  # mem1 f32 + spk1 bf16
                        + Op * 4 + Op * 2)  # mem2 f32 + spk2 bf16
        weights = (Din * Hp + Hp * Op + Hp + Op) * 4
        scratch = TB * (Hp + Op) * 4
        return 2 * (io + weights) + scratch

    ts = max(1, min(T, _MAX_TIME_BLOCK))
    while ts > 1 and footprint(ts) > budget_bytes:
        ts = max(1, ts // 2)
    return ts


def _make_snn_kernel(ts):
    """Builds a kernel processing `ts` time steps per grid iteration."""

    # Partial unroll for long time blocks: full unroll of a long TS pushes the
    # carried membranes + per-step temporaries past the 64-vreg register file
    # and the resulting spills land on the loaded vld/vst slots.
    unroll = True if ts <= 8 else 4

    def snn_kernel(x_ref, w1_ref, b1_ref, w2_ref, b2_ref,
                   spk1_ref, mem1_ref, spk2_ref, mem2_ref,
                   mem1_sc, mem2_sc):
        # grid = (batch_blocks, time_blocks); time is the innermost axis so
        # membrane scratch carries across time within each batch block.
        t_blk = pl.program_id(1)

        # Reset membrane state at the start of each batch block's time loop
        # (lif.reset_mem()).
        @pl.when(t_blk == 0)
        def _():
            mem1_sc[...] = jnp.zeros_like(mem1_sc)
            mem2_sc[...] = jnp.zeros_like(mem2_sc)

        # Hoist weight/bias loads and bias broadcasts out of the step loop
        # (JAX does not CSE broadcast_in_dim; without the hoist we'd
        # re-broadcast (1,Hp)->(TB,Hp) TS times per grid iteration).
        w1 = w1_ref[...]
        w2 = w2_ref[...]
        b1 = jnp.broadcast_to(b1_ref[...], mem1_sc.shape)
        b2 = jnp.broadcast_to(b2_ref[...], mem2_sc.shape)

        def step(s, carry):
            m1, m2 = carry

            x_t = x_ref[s]  # (TB, Din)

            # Layer 1: synapse (linear) + Leaky LIF (reset by subtraction,
            # reset decided by the *previous* membrane, matching snntorch).
            curr1 = jnp.dot(x_t, w1, preferred_element_type=jnp.float32) + b1
            m1 = BETA * m1 + curr1 - jnp.where(m1 > THRESH, THRESH, 0.0)
            fired1 = m1 > THRESH
            spk1 = fired1.astype(jnp.float32)

            # Layer 2: synapse (linear) + Leaky LIF.
            curr2 = jnp.dot(spk1, w2, preferred_element_type=jnp.float32) + b2
            m2 = BETA * m2 + curr2 - jnp.where(m2 > THRESH, THRESH, 0.0)
            fired2 = m2 > THRESH

            # Record this step into the (TS, TB, *) output slabs.  Spikes are
            # exactly 0/1 -> bf16 recording is bit-exact and halves writeback.
            spk1_ref[s] = fired1.astype(jnp.bfloat16)
            mem1_ref[s] = m1
            spk2_ref[s] = fired2.astype(jnp.bfloat16)
            mem2_ref[s] = m2
            return (m1, m2)

        m1, m2 = lax.fori_loop(0, ts, step, (mem1_sc[...], mem2_sc[...]),
                               unroll=unroll)

        # Carry membrane state to the next time block.
        mem1_sc[...] = m1
        mem2_sc[...] = m2

    return snn_kernel


@jax.jit
def snn_forward(x, w1, b1, w2, b2):
    T, B, Din = x.shape
    H = w1.shape[1]
    O = w2.shape[1]

    # Lane-dense / sublane-aligned padded sizes.
    # TODO(synk): H=10 -> 128 and O=4 -> 128 padding inflates recorded-output
    # HBM bytes at these toy sizes; if production feature dims are tiny,
    # repack outputs lane-densely instead of padding.
    Hp = _round_up(H, LANE)
    Op = _round_up(O, LANE)

    # Batch blocking.  Prefer nb >= 2 so the "parallel" batch axis can shard
    # across both TensorCores on megacore parts (v7x); time is recurrent and
    # cannot be parallelized.
    Bp = _round_up(B, SUBLANE)
    if Bp > LANE:
        Bp = _round_up(Bp, LANE)        # large batches: 128-row blocks
        TB = LANE
    elif Bp > SUBLANE:
        Bp = _round_up(Bp, 2 * SUBLANE)  # modest batches: split into 2 blocks
        TB = Bp // 2
    else:
        TB = Bp                          # tiny batch: single sublane block

    # Time block from an explicit VMEM budget (safe on all generations).
    TS = _pick_time_block(T, TB, Din, Hp, Op, _VMEM_TILE_BUDGET)
    Tp = _round_up(T, TS)

    # Zero-pad.  Padded hidden/output units get zero weight columns/rows and
    # zero bias, so they never spike and never feed back into real units.
    # Padded batch rows / trailing time steps are sliced off below.
    xp = jnp.pad(x, ((0, Tp - T), (0, Bp - B), (0, 0)))
    w1p = jnp.pad(w1, ((0, 0), (0, Hp - H)))
    b1p = jnp.pad(b1, ((0, 0), (0, Hp - H)))
    w2p = jnp.pad(w2, ((0, Hp - H), (0, Op - O)))
    b2p = jnp.pad(b2, ((0, 0), (0, Op - O)))

    nb = Bp // TB
    nt = Tp // TS

    kernel = _make_snn_kernel(TS)

    grid_spec = pltpu.PrefetchScalarGridSpec(
        num_scalar_prefetch=0,
        grid=(nb, nt),
        in_specs=[
            pl.BlockSpec((TS, TB, Din), lambda b, t: (t, b, 0)),
            pl.BlockSpec((Din, Hp), lambda b, t: (0, 0)),
            pl.BlockSpec((1, Hp), lambda b, t: (0, 0)),
            pl.BlockSpec((Hp, Op), lambda b, t: (0, 0)),
            pl.BlockSpec((1, Op), lambda b, t: (0, 0)),
        ],
        out_specs=[
            pl.BlockSpec((TS, TB, Hp), lambda b, t: (t, b, 0)),
            pl.BlockSpec((TS, TB, Hp), lambda b, t: (t, b, 0)),
            pl.BlockSpec((TS, TB, Op), lambda b, t: (t, b, 0)),
            pl.BlockSpec((TS, TB, Op), lambda b, t: (t, b, 0)),
        ],
        scratch_shapes=[
            pltpu.VMEM((TB, Hp), jnp.float32),  # mem1 carry
            pltpu.VMEM((TB, Op), jnp.float32),  # mem2 carry
        ],
    )

    spk1, mem1, spk2, mem2 = pl.pallas_call(
        kernel,
        out_shape=(
            jax.ShapeDtypeStruct((Tp, Bp, Hp), jnp.bfloat16),  # spk1_rec
            jax.ShapeDtypeStruct((Tp, Bp, Hp), jnp.float32),   # mem1_rec
            jax.ShapeDtypeStruct((Tp, Bp, Op), jnp.bfloat16),  # spk2_rec
            jax.ShapeDtypeStruct((Tp, Bp, Op), jnp.float32),   # mem2_rec
        ),
        grid_spec=grid_spec,
        compiler_params=pltpu.CompilerParams(
            # batch blocks are independent; time blocks carry membrane state
            dimension_semantics=("parallel", "arbitrary"),
            vmem_limit_bytes=_VMEM_LIMIT_BYTES,
        ),
    )(xp, w1p, b1p, w2p, b2p)

    # Spikes are returned as bf16 (exactly 0/1, bit-exact); membranes as f32.
    return (spk1[:T, :B, :H], mem1[:T, :B, :H],
            spk2[:T, :B, :O], mem2[:T, :B, :O])


def snn_reference(x, w1, b1, w2, b2):
    """Pure-JAX reference (lax.scan over time) for correctness checking."""
    T, B, _ = x.shape
    H, O = w1.shape[1], w2.shape[1]

    def step(carry, x_t):
        mem1, mem2 = carry
        curr1 = x_t @ w1 + b1
        reset1 = (mem1 > THRESH).astype(jnp.float32)
        mem1 = BETA * mem1 + curr1 - reset1 * THRESH
        spk1 = (mem1 > THRESH).astype(jnp.float32)
        curr2 = spk1 @ w2 + b2
        reset2 = (mem2 > THRESH).astype(jnp.float32)
        mem2 = BETA * mem2 + curr2 - reset2 * THRESH
        spk2 = (mem2 > THRESH).astype(jnp.float32)
        return (mem1, mem2), (spk1, mem1, spk2, mem2)

    init = (jnp.zeros((B, H), jnp.float32), jnp.zeros((B, O), jnp.float32))
    _, (spk1, mem1, spk2, mem2) = jax.lax.scan(step, init, x)
    return spk1, mem1, spk2, mem2


if __name__ == "__main__":
    # Small shapes consistent with SNN(num_inputs=2, num_hidden=10, num_outputs=4)
    num_steps, batch = 8, 2
    num_inputs, num_hidden, num_outputs = 2, 10, 4

    key = jax.random.PRNGKey(0)
    kx, kw1, kb1, kw2, kb2 = jax.random.split(key, 5)

    x = jax.random.normal(kx, (num_steps, batch, num_inputs), jnp.float32) * 2.0

    # Deterministic parameter init (nn.Linear-style uniform bounds).
    lim1 = 1.0 / np.sqrt(num_inputs)
    lim2 = 1.0 / np.sqrt(num_hidden)
    w1 = jax.random.uniform(kw1, (num_inputs, num_hidden), jnp.float32, -lim1, lim1)
    b1 = jax.random.uniform(kb1, (1, num_hidden), jnp.float32, -lim1, lim1)
    w2 = jax.random.uniform(kw2, (num_hidden, num_outputs), jnp.float32, -lim2, lim2)
    b2 = jax.random.uniform(kb2, (1, num_outputs), jnp.float32, -lim2, lim2)

    outs = snn_forward(x, w1, b1, w2, b2)
    outs = jax.block_until_ready(outs)

    refs = snn_reference(x, w1, b1, w2, b2)
    for o, r in zip(outs, refs):
        np.testing.assert_allclose(np.asarray(o).astype(np.float32),
                                   np.asarray(r),
                                   rtol=1e-5, atol=1e-5)

    print("KERNEL_OK")
</pallas_src>

<mosaic_0001>
module attributes {stable_mosaic.version = 11 : i64} {
  func.func @snn_kernel(%arg0: i32, %arg1: i32, %arg2: memref<8x8x2xf32, #tpu.memory_space<vmem>>, %arg3: memref<2x128xf32, #tpu.memory_space<vmem>>, %arg4: memref<1x128xf32, #tpu.memory_space<vmem>>, %arg5: memref<128x128xf32, #tpu.memory_space<vmem>>, %arg6: memref<1x128xf32, #tpu.memory_space<vmem>>, %arg7: memref<8x8x128xbf16, #tpu.memory_space<vmem>>, %arg8: memref<8x8x128xf32, #tpu.memory_space<vmem>>, %arg9: memref<8x8x128xbf16, #tpu.memory_space<vmem>>, %arg10: memref<8x8x128xf32, #tpu.memory_space<vmem>>, %arg11: memref<8x128xf32, #tpu.memory_space<vmem>>, %arg12: memref<8x128xf32, #tpu.memory_space<vmem>>) attributes {dimension_semantics = [#tpu.dimension_semantics<parallel>, #tpu.dimension_semantics<arbitrary>], iteration_bounds = array<i64: 1, 1>, scalar_prefetch = 0 : i64, scratch_operands = 2 : i64, tpu.core_type = #tpu.core_type<tc>, window_params = [{transform_indices = @transform_0, window_bounds = array<i64: 8, 8, 2>}, {pipeline_mode = #tpu.pipeline_mode<synchronous>, transform_indices = @transform_1, window_bounds = array<i64: 2, 128>}, {pipeline_mode = #tpu.pipeline_mode<synchronous>, transform_indices = @transform_2, window_bounds = array<i64: 1, 128>}, {pipeline_mode = #tpu.pipeline_mode<synchronous>, transform_indices = @transform_3, window_bounds = array<i64: 128, 128>}, {pipeline_mode = #tpu.pipeline_mode<synchronous>, transform_indices = @transform_4, window_bounds = array<i64: 1, 128>}, {transform_indices = @transform_5, window_bounds = array<i64: 8, 8, 128>}, {transform_indices = @transform_6, window_bounds = array<i64: 8, 8, 128>}, {transform_indices = @transform_7, window_bounds = array<i64: 8, 8, 128>}, {transform_indices = @transform_8, window_bounds = array<i64: 8, 8, 128>}]} {
    %c0_i32 = arith.constant 0 : i32
    %0 = arith.cmpi eq, %arg1, %c0_i32 : i32
    %1 = arith.extui %0 : i1 to i32
    %c0_i32_0 = arith.constant 0 : i32
    %2 = arith.cmpi ne, %1, %c0_i32_0 : i32
    scf.if %2 {
      %cst_192 = arith.constant 0.000000e+00 : f32
      %439 = vector.broadcast %cst_192 : f32 to vector<8x128xf32>
      %c0_193 = arith.constant 0 : index
      %c0_194 = arith.constant 0 : index
      %440 = vector.load %arg11[%c0_193, %c0_194] : memref<8x128xf32, #tpu.memory_space<vmem>>, vector<8x128xf32>
      tpu.vector_store %arg11[%c0_193, %c0_194], %439 {strides = array<i32>} : memref<8x128xf32, #tpu.memory_space<vmem>>, vector<8x128xf32>,
      %cst_195 = arith.constant 0.000000e+00 : f32
      %441 = vector.broadcast %cst_195 : f32 to vector<8x128xf32>
      %c0_196 = arith.constant 0 : index
      %c0_197 = arith.constant 0 : index
      %442 = vector.load %arg12[%c0_196, %c0_197] : memref<8x128xf32, #tpu.memory_space<vmem>>, vector<8x128xf32>
      tpu.vector_store %arg12[%c0_196, %c0_197], %441 {strides = array<i32>} : memref<8x128xf32, #tpu.memory_space<vmem>>, vector<8x128xf32>,
    } else {
    }
    %c0 = arith.constant 0 : index
    %c0_1 = arith.constant 0 : index
    %3 = vector.load %arg3[%c0, %c0_1] : memref<2x128xf32, #tpu.memory_space<vmem>>, vector<2x128xf32>
    %c0_2 = arith.constant 0 : index
    %c0_3 = arith.constant 0 : index
    %4 = vector.load %arg5[%c0_2, %c0_3] : memref<128x128xf32, #tpu.memory_space<vmem>>, vector<128x128xf32>
    %c0_4 = arith.constant 0 : index
    %c0_5 = arith.constant 0 : index
    %5 = vector.load %arg4[%c0_4, %c0_5] : memref<1x128xf32, #tpu.memory_space<vmem>>, vector<1x128xf32>
    %6 = vector.shape_cast %5 : vector<1x128xf32> to vector<1x128xf32>
    %7 = vector.broadcast %6 : vector<1x128xf32> to vector<8x128xf32>
    %c0_6 = arith.constant 0 : index
    %c0_7 = arith.constant 0 : index
    %8 = vector.load %arg6[%c0_6, %c0_7] : memref<1x128xf32, #tpu.memory_space<vmem>>, vector<1x128xf32>
    %9 = vector.shape_cast %8 : vector<1x128xf32> to vector<1x128xf32>
    %10 = vector.broadcast %9 : vector<1x128xf32> to vector<8x128xf32>
    %c0_8 = arith.constant 0 : index
    %c0_9 = arith.constant 0 : index
    %11 = vector.load %arg11[%c0_8, %c0_9] : memref<8x128xf32, #tpu.memory_space<vmem>>, vector<8x128xf32>
    %c0_10 = arith.constant 0 : index
    %c0_11 = arith.constant 0 : index
    %12 = vector.load %arg12[%c0_10, %c0_11] : memref<8x128xf32, #tpu.memory_space<vmem>>, vector<8x128xf32>
    %c0_i32_12 = arith.constant 0 : i32
    %13 = arith.index_cast %c0_i32_12 : i32 to index
    %c0_13 = arith.constant 0 : index
    %c0_14 = arith.constant 0 : index
    %14 = vector.load %arg2[%13, %c0_13, %c0_14] : memref<8x8x2xf32, #tpu.memory_space<vmem>>, vector<1x8x2xf32>
    %15 = vector.shape_cast %14 : vector<1x8x2xf32> to vector<8x2xf32>
    %cst = arith.constant dense<0.000000e+00> : vector<8x128xf32>
    %16 = tpu.matmul %15, %3, %cst {dimension_numbers = #tpu.dot_dimension_numbers<[1], [0], [0], [1], [0, 0, 1, 1], [], []>} : vector<8x2xf32>, vector<2x128xf32>, vector<8x128xf32> -> vector<8x128xf32>
    %17 = arith.addf %16, %7 : vector<8x128xf32>
    %cst_15 = arith.constant 5.000000e-01 : f32
    %18 = vector.broadcast %cst_15 : f32 to vector<8x128xf32>
    %19 = arith.mulf %18, %11 : vector<8x128xf32>
    %20 = arith.addf %19, %17 : vector<8x128xf32>
    %cst_16 = arith.constant 1.000000e+00 : f32
    %21 = vector.broadcast %cst_16 : f32 to vector<8x128xf32>
    %22 = arith.cmpf ogt, %11, %21 : vector<8x128xf32>
    %cst_17 = arith.constant 1.000000e+00 : f32
    %cst_18 = arith.constant 0.000000e+00 : f32
    %23 = vector.broadcast %cst_17 : f32 to vector<8x128xf32>
    %24 = vector.broadcast %cst_18 : f32 to vector<8x128xf32>
    %25 = arith.select %22, %23, %24 : vector<8x128xi1>, vector<8x128xf32>
    %26 = arith.subf %20, %25 : vector<8x128xf32>
    %cst_19 = arith.constant 1.000000e+00 : f32
    %27 = vector.broadcast %cst_19 : f32 to vector<8x128xf32>
    %28 = arith.cmpf ogt, %26, %27 : vector<8x128xf32>
    %29 = arith.extui %28 : vector<8x128xi1> to vector<8x128xi32>
    %30 = arith.sitofp %29 : vector<8x128xi32> to vector<8x128xf32>
    %cst_20 = arith.constant dense<0.000000e+00> : vector<8x128xf32>
    %31 = tpu.matmul %30, %4, %cst_20 {dimension_numbers = #tpu.dot_dimension_numbers<[1], [0], [0], [1], [0, 0, 1, 1], [], []>} : vector<8x128xf32>, vector<128x128xf32>, vector<8x128xf32> -> vector<8x128xf32>
    %32 = arith.addf %31, %10 : vector<8x128xf32>
    %cst_21 = arith.constant 5.000000e-01 : f32
    %33 = vector.broadcast %cst_21 : f32 to vector<8x128xf32>
    %34 = arith.mulf %33, %12 : vector<8x128xf32>
    %35 = arith.addf %34, %32 : vector<8x128xf32>
    %cst_22 = arith.constant 1.000000e+00 : f32
    %36 = vector.broadcast %cst_22 : f32 to vector<8x128xf32>
    %37 = arith.cmpf ogt, %12, %36 : vector<8x128xf32>
    %cst_23 = arith.constant 1.000000e+00 : f32
    %cst_24 = arith.constant 0.000000e+00 : f32
    %38 = vector.broadcast %cst_23 : f32 to vector<8x128xf32>
    %39 = vector.broadcast %cst_24 : f32 to vector<8x128xf32>
    %40 = arith.select %37, %38, %39 : vector<8x128xi1>, vector<8x128xf32>
    %41 = arith.subf %35, %40 : vector<8x128xf32>
    %cst_25 = arith.constant 1.000000e+00 : f32
    %42 = vector.broadcast %cst_25 : f32 to vector<8x128xf32>
    %43 = arith.cmpf ogt, %41, %42 : vector<8x128xf32>
    %44 = arith.extui %28 : vector<8x128xi1> to vector<8x128xi32>
    %45 = arith.sitofp %44 : vector<8x128xi32> to vector<8x128xf32>
    %46 = arith.truncf %45 : vector<8x128xf32> to vector<8x128xbf16>
    %47 = arith.index_cast %c0_i32_12 : i32 to index
    %c0_26 = arith.constant 0 : index
    %c0_27 = arith.constant 0 : index
    %48 = vector.load %arg7[%47, %c0_26, %c0_27] : memref<8x8x128xbf16, #tpu.memory_space<vmem>>, vector<1x8x128xbf16>
    %49 = vector.shape_cast %48 : vector<1x8x128xbf16> to vector<8x128xbf16>
    %50 = vector.shape_cast %46 : vector<8x128xbf16> to vector<1x8x128xbf16>
    tpu.vector_store %arg7[%47, %c0_26, %c0_27], %50 {strides = array<i32>} : memref<8x8x128xbf16, #tpu.memory_space<vmem>>, vector<1x8x128xbf16>,
    %51 = arith.index_cast %c0_i32_12 : i32 to index
    %c0_28 = arith.constant 0 : index
    %c0_29 = arith.constant 0 : index
    %52 = vector.load %arg8[%51, %c0_28, %c0_29] : memref<8x8x128xf32, #tpu.memory_space<vmem>>, vector<1x8x128xf32>
    %53 = vector.shape_cast %52 : vector<1x8x128xf32> to vector<8x128xf32>
    %54 = vector.shape_cast %26 : vector<8x128xf32> to vector<1x8x128xf32>
    tpu.vector_store %arg8[%51, %c0_28, %c0_29], %54 {strides = array<i32>} : memref<8x8x128xf32, #tpu.memory_space<vmem>>, vector<1x8x128xf32>,
    %55 = arith.extui %43 : vector<8x128xi1> to vector<8x128xi32>
    %56 = arith.sitofp %55 : vector<8x128xi32> to vector<8x128xf32>
    %57 = arith.truncf %56 : vector<8x128xf32> to vector<8x128xbf16>
    %58 = arith.index_cast %c0_i32_12 : i32 to index
    %c0_30 = arith.constant 0 : index
    %c0_31 = arith.constant 0 : index
    %59 = vector.load %arg9[%58, %c0_30, %c0_31] : memref<8x8x128xbf16, #tpu.memory_space<vmem>>, vector<1x8x128xbf16>
    %60 = vector.shape_cast %59 : vector<1x8x128xbf16> to vector<8x128xbf16>
    %61 = vector.shape_cast %57 : vector<8x128xbf16> to vector<1x8x128xbf16>
    tpu.vector_store %arg9[%58, %c0_30, %c0_31], %61 {strides = array<i32>} : memref<8x8x128xbf16, #tpu.memory_space<vmem>>, vector<1x8x128xbf16>,
    %62 = arith.index_cast %c0_i32_12 : i32 to index
    %c0_32 = arith.constant 0 : index
    %c0_33 = arith.constant 0 : index
    %63 = vector.load %arg10[%62, %c0_32, %c0_33] : memref<8x8x128xf32, #tpu.memory_space<vmem>>, vector<1x8x128xf32>
    %64 = vector.shape_cast %63 : vector<1x8x128xf32> to vector<8x128xf32>
    %65 = vector.shape_cast %41 : vector<8x128xf32> to vector<1x8x128xf32>
    tpu.vector_store %arg10[%62, %c0_32, %c0_33], %65 {strides = array<i32>} : memref<8x8x128xf32, #tpu.memory_space<vmem>>, vector<1x8x128xf32>,
    %c1_i32 = arith.constant 1 : i32
    %66 = arith.index_cast %c1_i32 : i32 to index
    %c0_34 = arith.constant 0 : index
    %c0_35 = arith.constant 0 : index
    %67 = vector.load %arg2[%66, %c0_34, %c0_35] : memref<8x8x2xf32, #tpu.memory_space<vmem>>, vector<1x8x2xf32>
    %68 = vector.shape_cast %67 : vector<1x8x2xf32> to vector<8x2xf32>
    %cst_36 = arith.constant dense<0.000000e+00> : vector<8x128xf32>
    %69 = tpu.matmul %68, %3, %cst_36 {dimension_numbers = #tpu.dot_dimension_numbers<[1], [0], [0], [1], [0, 0, 1, 1], [], []>} : vector<8x2xf32>, vector<2x128xf32>, vector<8x128xf32> -> vector<8x128xf32>
    %70 = arith.addf %69, %7 : vector<8x128xf32>
    %cst_37 = arith.constant 5.000000e-01 : f32
    %71 = vector.broadcast %cst_37 : f32 to vector<8x128xf32>
    %72 = arith.mulf %71, %26 : vector<8x128xf32>
    %73 = arith.addf %72, %70 : vector<8x128xf32>
    %cst_38 = arith.constant 1.000000e+00 : f32
    %74 = vector.broadcast %cst_38 : f32 to vector<8x128xf32>
    %75 = arith.cmpf ogt, %26, %74 : vector<8x128xf32>
    %cst_39 = arith.constant 1.000000e+00 : f32
    %cst_40 = arith.constant 0.000000e+00 : f32
    %76 = vector.broadcast %cst_39 : f32 to vector<8x128xf32>
    %77 = vector.broadcast %cst_40 : f32 to vector<8x128xf32>
    %78 = arith.select %75, %76, %77 : vector<8x128xi1>, vector<8x128xf32>
    %79 = arith.subf %73, %78 : vector<8x128xf32>
    %cst_41 = arith.constant 1.000000e+00 : f32
    %80 = vector.broadcast %cst_41 : f32 to vector<8x128xf32>
    %81 = arith.cmpf ogt, %79, %80 : vector<8x128xf32>
    %82 = arith.extui %81 : vector<8x128xi1> to vector<8x128xi32>
    %83 = arith.sitofp %82 : vector<8x128xi32> to vector<8x128xf32>
    %cst_42 = arith.constant dense<0.000000e+00> : vector<8x128xf32>
    %84 = tpu.matmul %83, %4, %cst_42 {dimension_numbers = #tpu.dot_dimension_numbers<[1], [0], [0], [1], [0, 0, 1, 1], [], []>} : vector<8x128xf32>, vector<128x128xf32>, vector<8x128xf32> -> vector<8x128xf32>
    %85 = arith.addf %84, %10 : vector<8x128xf32>
    %cst_43 = arith.constant 5.000000e-01 : f32
    %86 = vector.broadcast %cst_43 : f32 to vector<8x128xf32>
    %87 = arith.mulf %86, %41 : vector<8x128xf32>
    %88 = arith.addf %87, %85 : vector<8x128xf32>
    %cst_44 = arith.constant 1.000000e+00 : f32
    %89 = vector.broadcast %cst_44 : f32 to vector<8x128xf32>
    %90 = arith.cmpf ogt, %41, %89 : vector<8x128xf32>
    %cst_45 = arith.constant 1.000000e+00 : f32
    %cst_46 = arith.constant 0.000000e+00 : f32
    %91 = vector.broadcast %cst_45 : f32 to vector<8x128xf32>
    %92 = vector.broadcast %cst_46 : f32 to vector<8x128xf32>
    %93 = arith.select %90, %91, %92 : vector<8x128xi1>, vector<8x128xf32>
    %94 = arith.subf %88, %93 : vector<8x128xf32>
    %cst_47 = arith.constant 1.000000e+00 : f32
    %95 = vector.broadcast %cst_47 : f32 to vector<8x128xf32>
    %96 = arith.cmpf ogt, %94, %95 : vector<8x128xf32>
    %97 = arith.extui %81 : vector<8x128xi1> to vector<8x128xi32>
    %98 = arith.sitofp %97 : vector<8x128xi32> to vector<8x128xf32>
    %99 = arith.truncf %98 : vector<8x128xf32> to vector<8x128xbf16>
    %100 = arith.index_cast %c1_i32 : i32 to index
    %c0_48 = arith.constant 0 : index
    %c0_49 = arith.constant 0 : index
    %101 = vector.load %arg7[%100, %c0_48, %c0_49] : memref<8x8x128xbf16, #tpu.memory_space<vmem>>, vector<1x8x128xbf16>
    %102 = vector.shape_cast %101 : vector<1x8x128xbf16> to vector<8x128xbf16>
    %103 = vector.shape_cast %99 : vector<8x128xbf16> to vector<1x8x128xbf16>
    tpu.vector_store %arg7[%100, %c0_48, %c0_49], %103 {strides = array<i32>} : memref<8x8x128xbf16, #tpu.memory_space<vmem>>, vector<1x8x128xbf16>,
    %104 = arith.index_cast %c1_i32 : i32 to index
    %c0_50 = arith.constant 0 : index
    %c0_51 = arith.constant 0 : index
    %105 = vector.load %arg8[%104, %c0_50, %c0_51] : memref<8x8x128xf32, #tpu.memory_space<vmem>>, vector<1x8x128xf32>
    %106 = vector.shape_cast %105 : vector<1x8x128xf32> to vector<8x128xf32>
    %107 = vector.shape_cast %79 : vector<8x128xf32> to vector<1x8x128xf32>
    tpu.vector_store %arg8[%104, %c0_50, %c0_51], %107 {strides = array<i32>} : memref<8x8x128xf32, #tpu.memory_space<vmem>>, vector<1x8x128xf32>,
    %108 = arith.extui %96 : vector<8x128xi1> to vector<8x128xi32>
    %109 = arith.sitofp %108 : vector<8x128xi32> to vector<8x128xf32>
    %110 = arith.truncf %109 : vector<8x128xf32> to vector<8x128xbf16>
    %111 = arith.index_cast %c1_i32 : i32 to index
    %c0_52 = arith.constant 0 : index
    %c0_53 = arith.constant 0 : index
    %112 = vector.load %arg9[%111, %c0_52, %c0_53] : memref<8x8x128xbf16, #tpu.memory_space<vmem>>, vector<1x8x128xbf16>
    %113 = vector.shape_cast %112 : vector<1x8x128xbf16> to vector<8x128xbf16>
    %114 = vector.shape_cast %110 : vector<8x128xbf16> to vector<1x8x128xbf16>
    tpu.vector_store %arg9[%111, %c0_52, %c0_53], %114 {strides = array<i32>} : memref<8x8x128xbf16, #tpu.memory_space<vmem>>, vector<1x8x128xbf16>,
    %115 = arith.index_cast %c1_i32 : i32 to index
    %c0_54 = arith.constant 0 : index
    %c0_55 = arith.constant 0 : index
    %116 = vector.load %arg10[%115, %c0_54, %c0_55] : memref<8x8x128xf32, #tpu.memory_space<vmem>>, vector<1x8x128xf32>
    %117 = vector.shape_cast %116 : vector<1x8x128xf32> to vector<8x128xf32>
    %118 = vector.shape_cast %94 : vector<8x128xf32> to vector<1x8x128xf32>
    tpu.vector_store %arg10[%115, %c0_54, %c0_55], %118 {strides = array<i32>} : memref<8x8x128xf32, #tpu.memory_space<vmem>>, vector<1x8x128xf32>,
    %c2_i32 = arith.constant 2 : i32
    %119 = arith.index_cast %c2_i32 : i32 to index
    %c0_56 = arith.constant 0 : index
    %c0_57 = arith.constant 0 : index
    %120 = vector.load %arg2[%119, %c0_56, %c0_57] : memref<8x8x2xf32, #tpu.memory_space<vmem>>, vector<1x8x2xf32>
    %121 = vector.shape_cast %120 : vector<1x8x2xf32> to vector<8x2xf32>
    %cst_58 = arith.constant dense<0.000000e+00> : vector<8x128xf32>
    %122 = tpu.matmul %121, %3, %cst_58 {dimension_numbers = #tpu.dot_dimension_numbers<[1], [0], [0], [1], [0, 0, 1, 1], [], []>} : vector<8x2xf32>, vector<2x128xf32>, vector<8x128xf32> -> vector<8x128xf32>
    %123 = arith.addf %122, %7 : vector<8x128xf32>
    %cst_59 = arith.constant 5.000000e-01 : f32
    %124 = vector.broadcast %cst_59 : f32 to vector<8x128xf32>
    %125 = arith.mulf %124, %79 : vector<8x128xf32>
    %126 = arith.addf %125, %123 : vector<8x128xf32>
    %cst_60 = arith.constant 1.000000e+00 : f32
    %127 = vector.broadcast %cst_60 : f32 to vector<8x128xf32>
    %128 = arith.cmpf ogt, %79, %127 : vector<8x128xf32>
    %cst_61 = arith.constant 1.000000e+00 : f32
    %cst_62 = arith.constant 0.000000e+00 : f32
    %129 = vector.broadcast %cst_61 : f32 to vector<8x128xf32>
    %130 = vector.broadcast %cst_62 : f32 to vector<8x128xf32>
    %131 = arith.select %128, %129, %130 : vector<8x128xi1>, vector<8x128xf32>
    %132 = arith.subf %126, %131 : vector<8x128xf32>
    %cst_63 = arith.constant 1.000000e+00 : f32
    %133 = vector.broadcast %cst_63 : f32 to vector<8x128xf32>
    %134 = arith.cmpf ogt, %132, %133 : vector<8x128xf32>
    %135 = arith.extui %134 : vector<8x128xi1> to vector<8x128xi32>
    %136 = arith.sitofp %135 : vector<8x128xi32> to vector<8x128xf32>
    %cst_64 = arith.constant dense<0.000000e+00> : vector<8x128xf32>
    %137 = tpu.matmul %136, %4, %cst_64 {dimension_numbers = #tpu.dot_dimension_numbers<[1], [0], [0], [1], [0, 0, 1, 1], [], []>} : vector<8x128xf32>, vector<128x128xf32>, vector<8x128xf32> -> vector<8x128xf32>
    %138 = arith.addf %137, %10 : vector<8x128xf32>
    %cst_65 = arith.constant 5.000000e-01 : f32
    %139 = vector.broadcast %cst_65 : f32 to vector<8x128xf32>
    %140 = arith.mulf %139, %94 : vector<8x128xf32>
    %141 = arith.addf %140, %138 : vector<8x128xf32>
    %cst_66 = arith.constant 1.000000e+00 : f32
    %142 = vector.broadcast %cst_66 : f32 to vector<8x128xf32>
    %143 = arith.cmpf ogt, %94, %142 : vector<8x128xf32>
    %cst_67 = arith.constant 1.000000e+00 : f32
    %cst_68 = arith.constant 0.000000e+00 : f32
    %144 = vector.broadcast %cst_67 : f32 to vector<8x128xf32>
    %145 = vector.broadcast %cst_68 : f32 to vector<8x128xf32>
    %146 = arith.select %143, %144, %145 : vector<8x128xi1>, vector<8x128xf32>
    %147 = arith.subf %141, %146 : vector<8x128xf32>
    %cst_69 = arith.constant 1.000000e+00 : f32
    %148 = vector.broadcast %cst_69 : f32 to vector<8x128xf32>
    %149 = arith.cmpf ogt, %147, %148 : vector<8x128xf32>
    %150 = arith.extui %134 : vector<8x128xi1> to vector<8x128xi32>
    %151 = arith.sitofp %150 : vector<8x128xi32> to vector<8x128xf32>
    %152 = arith.truncf %151 : vector<8x128xf32> to vector<8x128xbf16>
    %153 = arith.index_cast %c2_i32 : i32 to index
    %c0_70 = arith.constant 0 : index
    %c0_71 = arith.constant 0 : index
    %154 = vector.load %arg7[%153, %c0_70, %c0_71] : memref<8x8x128xbf16, #tpu.memory_space<vmem>>, vector<1x8x128xbf16>
    %155 = vector.shape_cast %154 : vector<1x8x128xbf16> to vector<8x128xbf16>
    %156 = vector.shape_cast %152 : vector<8x128xbf16> to vector<1x8x128xbf16>
    tpu.vector_store %arg7[%153, %c0_70, %c0_71], %156 {strides = array<i32>} : memref<8x8x128xbf16, #tpu.memory_space<vmem>>, vector<1x8x128xbf16>,
    %157 = arith.index_cast %c2_i32 : i32 to index
    %c0_72 = arith.constant 0 : index
    %c0_73 = arith.constant 0 : index
    %158 = vector.load %arg8[%157, %c0_72, %c0_73] : memref<8x8x128xf32, #tpu.memory_space<vmem>>, vector<1x8x128xf32>
    %159 = vector.shape_cast %158 : vector<1x8x128xf32> to vector<8x128xf32>
    %160 = vector.shape_cast %132 : vector<8x128xf32> to vector<1x8x128xf32>
    tpu.vector_store %arg8[%157, %c0_72, %c0_73], %160 {strides = array<i32>} : memref<8x8x128xf32, #tpu.memory_space<vmem>>, vector<1x8x128xf32>,
    %161 = arith.extui %149 : vector<8x128xi1> to vector<8x128xi32>
    %162 = arith.sitofp %161 : vector<8x128xi32> to vector<8x128xf32>
    %163 = arith.truncf %162 : vector<8x128xf32> to vector<8x128xbf16>
    %164 = arith.index_cast %c2_i32 : i32 to index
    %c0_74 = arith.constant 0 : index
    %c0_75 = arith.constant 0 : index
    %165 = vector.load %arg9[%164, %c0_74, %c0_75] : memref<8x8x128xbf16, #tpu.memory_space<vmem>>, vector<1x8x128xbf16>
    %166 = vector.shape_cast %165 : vector<1x8x128xbf16> to vector<8x128xbf16>
    %167 = vector.shape_cast %163 : vector<8x128xbf16> to vector<1x8x128xbf16>
    tpu.vector_store %arg9[%164, %c0_74, %c0_75], %167 {strides = array<i32>} : memref<8x8x128xbf16, #tpu.memory_space<vmem>>, vector<1x8x128xbf16>,
    %168 = arith.index_cast %c2_i32 : i32 to index
    %c0_76 = arith.constant 0 : index
    %c0_77 = arith.constant 0 : index
    %169 = vector.load %arg10[%168, %c0_76, %c0_77] : memref<8x8x128xf32, #tpu.memory_space<vmem>>, vector<1x8x128xf32>
    %170 = vector.shape_cast %169 : vector<1x8x128xf32> to vector<8x128xf32>
    %171 = vector.shape_cast %147 : vector<8x128xf32> to vector<1x8x128xf32>
    tpu.vector_store %arg10[%168, %c0_76, %c0_77], %171 {strides = array<i32>} : memref<8x8x128xf32, #tpu.memory_space<vmem>>, vector<1x8x128xf32>,
    %c3_i32 = arith.constant 3 : i32
    %172 = arith.index_cast %c3_i32 : i32 to index
    %c0_78 = arith.constant 0 : index
    %c0_79 = arith.constant 0 : index
    %173 = vector.load %arg2[%172, %c0_78, %c0_79] : memref<8x8x2xf32, #tpu.memory_space<vmem>>, vector<1x8x2xf32>
    %174 = vector.shape_cast %173 : vector<1x8x2xf32> to vector<8x2xf32>
    %cst_80 = arith.constant dense<0.000000e+00> : vector<8x128xf32>
    %175 = tpu.matmul %174, %3, %cst_80 {dimension_numbers = #tpu.dot_dimension_numbers<[1], [0], [0], [1], [0, 0, 1, 1], [], []>} : vector<8x2xf32>, vector<2x128xf32>, vector<8x128xf32> -> vector<8x128xf32>
    %176 = arith.addf %175, %7 : vector<8x128xf32>
    %cst_81 = arith.constant 5.000000e-01 : f32
    %177 = vector.broadcast %cst_81 : f32 to vector<8x128xf32>
    %178 = arith.mulf %177, %132 : vector<8x128xf32>
    %179 = arith.addf %178, %176 : vector<8x128xf32>
    %cst_82 = arith.constant 1.000000e+00 : f32
    %180 = vector.broadcast %cst_82 : f32 to vector<8x128xf32>
    %181 = arith.cmpf ogt, %132, %180 : vector<8x128xf32>
    %cst_83 = arith.constant 1.000000e+00 : f32
    %cst_84 = arith.constant 0.000000e+00 : f32
    %182 = vector.broadcast %cst_83 : f32 to vector<8x128xf32>
    %183 = vector.broadcast %cst_84 : f32 to vector<8x128xf32>
    %184 = arith.select %181, %182, %183 : vector<8x128xi1>, vector<8x128xf32>
    %185 = arith.subf %179, %184 : vector<8x128xf32>
    %cst_85 = arith.constant 1.000000e+00 : f32
    %186 = vector.broadcast %cst_85 : f32 to vector<8x128xf32>
    %187 = arith.cmpf ogt, %185, %186 : vector<8x128xf32>
    %188 = arith.extui %187 : vector<8x128xi1> to vector<8x128xi32>
    %189 = arith.sitofp %188 : vector<8x128xi32> to vector<8x128xf32>
    %cst_86 = arith.constant dense<0.000000e+00> : vector<8x128xf32>
    %190 = tpu.matmul %189, %4, %cst_86 {dimension_numbers = #tpu.dot_dimension_numbers<[1], [0], [0], [1], [0, 0, 1, 1], [], []>} : vector<8x128xf32>, vector<128x128xf32>, vector<8x128xf32> -> vector<8x128xf32>
    %191 = arith.addf %190, %10 : vector<8x128xf32>
    %cst_87 = arith.constant 5.000000e-01 : f32
    %192 = vector.broadcast %cst_87 : f32 to vector<8x128xf32>
    %193 = arith.mulf %192, %147 : vector<8x128xf32>
    %194 = arith.addf %193, %191 : vector<8x128xf32>
    %cst_88 = arith.constant 1.000000e+00 : f32
    %195 = vector.broadcast %cst_88 : f32 to vector<8x128xf32>
    %196 = arith.cmpf ogt, %147, %195 : vector<8x128xf32>
    %cst_89 = arith.constant 1.000000e+00 : f32
    %cst_90 = arith.constant 0.000000e+00 : f32
    %197 = vector.broadcast %cst_89 : f32 to vector<8x128xf32>
    %198 = vector.broadcast %cst_90 : f32 to vector<8x128xf32>
    %199 = arith.select %196, %197, %198 : vector<8x128xi1>, vector<8x128xf32>
    %200 = arith.subf %194, %199 : vector<8x128xf32>
    %cst_91 = arith.constant 1.000000e+00 : f32
    %201 = vector.broadcast %cst_91 : f32 to vector<8x128xf32>
    %202 = arith.cmpf ogt, %200, %201 : vector<8x128xf32>
    %203 = arith.extui %187 : vector<8x128xi1> to vector<8x128xi32>
    %204 = arith.sitofp %203 : vector<8x128xi32> to vector<8x128xf32>
    %205 = arith.truncf %204 : vector<8x128xf32> to vector<8x128xbf16>
    %206 = arith.index_cast %c3_i32 : i32 to index
    %c0_92 = arith.constant 0 : index
    %c0_93 = arith.constant 0 : index
    %207 = vector.load %arg7[%206, %c0_92, %c0_93] : memref<8x8x128xbf16, #tpu.memory_space<vmem>>, vector<1x8x128xbf16>
    %208 = vector.shape_cast %207 : vector<1x8x128xbf16> to vector<8x128xbf16>
    %209 = vector.shape_cast %205 : vector<8x128xbf16> to vector<1x8x128xbf16>
    tpu.vector_store %arg7[%206, %c0_92, %c0_93], %209 {strides = array<i32>} : memref<8x8x128xbf16, #tpu.memory_space<vmem>>, vector<1x8x128xbf16>,
    %210 = arith.index_cast %c3_i32 : i32 to index
    %c0_94 = arith.constant 0 : index
    %c0_95 = arith.constant 0 : index
    %211 = vector.load %arg8[%210, %c0_94, %c0_95] : memref<8x8x128xf32, #tpu.memory_space<vmem>>, vector<1x8x128xf32>
    %212 = vector.shape_cast %211 : vector<1x8x128xf32> to vector<8x128xf32>
    %213 = vector.shape_cast %185 : vector<8x128xf32> to vector<1x8x128xf32>
    tpu.vector_store %arg8[%210, %c0_94, %c0_95], %213 {strides = array<i32>} : memref<8x8x128xf32, #tpu.memory_space<vmem>>, vector<1x8x128xf32>,
    %214 = arith.extui %202 : vector<8x128xi1> to vector<8x128xi32>
    %215 = arith.sitofp %214 : vector<8x128xi32> to vector<8x128xf32>
    %216 = arith.truncf %215 : vector<8x128xf32> to vector<8x128xbf16>
    %217 = arith.index_cast %c3_i32 : i32 to index
    %c0_96 = arith.constant 0 : index
    %c0_97 = arith.constant 0 : index
    %218 = vector.load %arg9[%217, %c0_96, %c0_97] : memref<8x8x128xbf16, #tpu.memory_space<vmem>>, vector<1x8x128xbf16>
    %219 = vector.shape_cast %218 : vector<1x8x128xbf16> to vector<8x128xbf16>
    %220 = vector.shape_cast %216 : vector<8x128xbf16> to vector<1x8x128xbf16>
    tpu.vector_store %arg9[%217, %c0_96, %c0_97], %220 {strides = array<i32>} : memref<8x8x128xbf16, #tpu.memory_space<vmem>>, vector<1x8x128xbf16>,
    %221 = arith.index_cast %c3_i32 : i32 to index
    %c0_98 = arith.constant 0 : index
    %c0_99 = arith.constant 0 : index
    %222 = vector.load %arg10[%221, %c0_98, %c0_99] : memref<8x8x128xf32, #tpu.memory_space<vmem>>, vector<1x8x128xf32>
    %223 = vector.shape_cast %222 : vector<1x8x128xf32> to vector<8x128xf32>
    %224 = vector.shape_cast %200 : vector<8x128xf32> to vector<1x8x128xf32>
    tpu.vector_store %arg10[%221, %c0_98, %c0_99], %224 {strides = array<i32>} : memref<8x8x128xf32, #tpu.memory_space<vmem>>, vector<1x8x128xf32>,
    %c4_i32 = arith.constant 4 : i32
    %225 = arith.index_cast %c4_i32 : i32 to index
    %c0_100 = arith.constant 0 : index
    %c0_101 = arith.constant 0 : index
    %226 = vector.load %arg2[%225, %c0_100, %c0_101] : memref<8x8x2xf32, #tpu.memory_space<vmem>>, vector<1x8x2xf32>
    %227 = vector.shape_cast %226 : vector<1x8x2xf32> to vector<8x2xf32>
    %cst_102 = arith.constant dense<0.000000e+00> : vector<8x128xf32>
    %228 = tpu.matmul %227, %3, %cst_102 {dimension_numbers = #tpu.dot_dimension_numbers<[1], [0], [0], [1], [0, 0, 1, 1], [], []>} : vector<8x2xf32>, vector<2x128xf32>, vector<8x128xf32> -> vector<8x128xf32>
    %229 = arith.addf %228, %7 : vector<8x128xf32>
    %cst_103 = arith.constant 5.000000e-01 : f32
    %230 = vector.broadcast %cst_103 : f32 to vector<8x128xf32>
    %231 = arith.mulf %230, %185 : vector<8x128xf32>
    %232 = arith.addf %231, %229 : vector<8x128xf32>
    %cst_104 = arith.constant 1.000000e+00 : f32
    %233 = vector.broadcast %cst_104 : f32 to vector<8x128xf32>
    %234 = arith.cmpf ogt, %185, %233 : vector<8x128xf32>
    %cst_105 = arith.constant 1.000000e+00 : f32
    %cst_106 = arith.constant 0.000000e+00 : f32
    %235 = vector.broadcast %cst_105 : f32 to vector<8x128xf32>
    %236 = vector.broadcast %cst_106 : f32 to vector<8x128xf32>
    %237 = arith.select %234, %235, %236 : vector<8x128xi1>, vector<8x128xf32>
    %238 = arith.subf %232, %237 : vector<8x128xf32>
    %cst_107 = arith.constant 1.000000e+00 : f32
    %239 = vector.broadcast %cst_107 : f32 to vector<8x128xf32>
    %240 = arith.cmpf ogt, %238, %239 : vector<8x128xf32>
    %241 = arith.extui %240 : vector<8x128xi1> to vector<8x128xi32>
    %242 = arith.sitofp %241 : vector<8x128xi32> to vector<8x128xf32>
    %cst_108 = arith.constant dense<0.000000e+00> : vector<8x128xf32>
    %243 = tpu.matmul %242, %4, %cst_108 {dimension_numbers = #tpu.dot_dimension_numbers<[1], [0], [0], [1], [0, 0, 1, 1], [], []>} : vector<8x128xf32>, vector<128x128xf32>, vector<8x128xf32> -> vector<8x128xf32>
    %244 = arith.addf %243, %10 : vector<8x128xf32>
    %cst_109 = arith.constant 5.000000e-01 : f32
    %245 = vector.broadcast %cst_109 : f32 to vector<8x128xf32>
    %246 = arith.mulf %245, %200 : vector<8x128xf32>
    %247 = arith.addf %246, %244 : vector<8x128xf32>
    %cst_110 = arith.constant 1.000000e+00 : f32
    %248 = vector.broadcast %cst_110 : f32 to vector<8x128xf32>
    %249 = arith.cmpf ogt, %200, %248 : vector<8x128xf32>
    %cst_111 = arith.constant 1.000000e+00 : f32
    %cst_112 = arith.constant 0.000000e+00 : f32
    %250 = vector.broadcast %cst_111 : f32 to vector<8x128xf32>
    %251 = vector.broadcast %cst_112 : f32 to vector<8x128xf32>
    %252 = arith.select %249, %250, %251 : vector<8x128xi1>, vector<8x128xf32>
    %253 = arith.subf %247, %252 : vector<8x128xf32>
    %cst_113 = arith.constant 1.000000e+00 : f32
    %254 = vector.broadcast %cst_113 : f32 to vector<8x128xf32>
    %255 = arith.cmpf ogt, %253, %254 : vector<8x128xf32>
    %256 = arith.extui %240 : vector<8x128xi1> to vector<8x128xi32>
    %257 = arith.sitofp %256 : vector<8x128xi32> to vector<8x128xf32>
    %258 = arith.truncf %257 : vector<8x128xf32> to vector<8x128xbf16>
    %259 = arith.index_cast %c4_i32 : i32 to index
    %c0_114 = arith.constant 0 : index
    %c0_115 = arith.constant 0 : index
    %260 = vector.load %arg7[%259, %c0_114, %c0_115] : memref<8x8x128xbf16, #tpu.memory_space<vmem>>, vector<1x8x128xbf16>
    %261 = vector.shape_cast %260 : vector<1x8x128xbf16> to vector<8x128xbf16>
    %262 = vector.shape_cast %258 : vector<8x128xbf16> to vector<1x8x128xbf16>
    tpu.vector_store %arg7[%259, %c0_114, %c0_115], %262 {strides = array<i32>} : memref<8x8x128xbf16, #tpu.memory_space<vmem>>, vector<1x8x128xbf16>,
    %263 = arith.index_cast %c4_i32 : i32 to index
    %c0_116 = arith.constant 0 : index
    %c0_117 = arith.constant 0 : index
    %264 = vector.load %arg8[%263, %c0_116, %c0_117] : memref<8x8x128xf32, #tpu.memory_space<vmem>>, vector<1x8x128xf32>
    %265 = vector.shape_cast %264 : vector<1x8x128xf32> to vector<8x128xf32>
    %266 = vector.shape_cast %238 : vector<8x128xf32> to vector<1x8x128xf32>
    tpu.vector_store %arg8[%263, %c0_116, %c0_117], %266 {strides = array<i32>} : memref<8x8x128xf32, #tpu.memory_space<vmem>>, vector<1x8x128xf32>,
    %267 = arith.extui %255 : vector<8x128xi1> to vector<8x128xi32>
    %268 = arith.sitofp %267 : vector<8x128xi32> to vector<8x128xf32>
    %269 = arith.truncf %268 : vector<8x128xf32> to vector<8x128xbf16>
    %270 = arith.index_cast %c4_i32 : i32 to index
    %c0_118 = arith.constant 0 : index
    %c0_119 = arith.constant 0 : index
    %271 = vector.load %arg9[%270, %c0_118, %c0_119] : memref<8x8x128xbf16, #tpu.memory_space<vmem>>, vector<1x8x128xbf16>
    %272 = vector.shape_cast %271 : vector<1x8x128xbf16> to vector<8x128xbf16>
    %273 = vector.shape_cast %269 : vector<8x128xbf16> to vector<1x8x128xbf16>
    tpu.vector_store %arg9[%270, %c0_118, %c0_119], %273 {strides = array<i32>} : memref<8x8x128xbf16, #tpu.memory_space<vmem>>, vector<1x8x128xbf16>,
    %274 = arith.index_cast %c4_i32 : i32 to index
    %c0_120 = arith.constant 0 : index
    %c0_121 = arith.constant 0 : index
    %275 = vector.load %arg10[%274, %c0_120, %c0_121] : memref<8x8x128xf32, #tpu.memory_space<vmem>>, vector<1x8x128xf32>
    %276 = vector.shape_cast %275 : vector<1x8x128xf32> to vector<8x128xf32>
    %277 = vector.shape_cast %253 : vector<8x128xf32> to vector<1x8x128xf32>
    tpu.vector_store %arg10[%274, %c0_120, %c0_121], %277 {strides = array<i32>} : memref<8x8x128xf32, #tpu.memory_space<vmem>>, vector<1x8x128xf32>,
    %c5_i32 = arith.constant 5 : i32
    %278 = arith.index_cast %c5_i32 : i32 to index
    %c0_122 = arith.constant 0 : index
    %c0_123 = arith.constant 0 : index
    %279 = vector.load %arg2[%278, %c0_122, %c0_123] : memref<8x8x2xf32, #tpu.memory_space<vmem>>, vector<1x8x2xf32>
    %280 = vector.shape_cast %279 : vector<1x8x2xf32> to vector<8x2xf32>
    %cst_124 = arith.constant dense<0.000000e+00> : vector<8x128xf32>
    %281 = tpu.matmul %280, %3, %cst_124 {dimension_numbers = #tpu.dot_dimension_numbers<[1], [0], [0], [1], [0, 0, 1, 1], [], []>} : vector<8x2xf32>, vector<2x128xf32>, vector<8x128xf32> -> vector<8x128xf32>
    %282 = arith.addf %281, %7 : vector<8x128xf32>
    %cst_125 = arith.constant 5.000000e-01 : f32
    %283 = vector.broadcast %cst_125 : f32 to vector<8x128xf32>
    %284 = arith.mulf %283, %238 : vector<8x128xf32>
    %285 = arith.addf %284, %282 : vector<8x128xf32>
    %cst_126 = arith.constant 1.000000e+00 : f32
    %286 = vector.broadcast %cst_126 : f32 to vector<8x128xf32>
    %287 = arith.cmpf ogt, %238, %286 : vector<8x128xf32>
    %cst_127 = arith.constant 1.000000e+00 : f32
    %cst_128 = arith.constant 0.000000e+00 : f32
    %288 = vector.broadcast %cst_127 : f32 to vector<8x128xf32>
    %289 = vector.broadcast %cst_128 : f32 to vector<8x128xf32>
    %290 = arith.select %287, %288, %289 : vector<8x128xi1>, vector<8x128xf32>
    %291 = arith.subf %285, %290 : vector<8x128xf32>
    %cst_129 = arith.constant 1.000000e+00 : f32
    %292 = vector.broadcast %cst_129 : f32 to vector<8x128xf32>
    %293 = arith.cmpf ogt, %291, %292 : vector<8x128xf32>
    %294 = arith.extui %293 : vector<8x128xi1> to vector<8x128xi32>
    %295 = arith.sitofp %294 : vector<8x128xi32> to vector<8x128xf32>
    %cst_130 = arith.constant dense<0.000000e+00> : vector<8x128xf32>
    %296 = tpu.matmul %295, %4, %cst_130 {dimension_numbers = #tpu.dot_dimension_numbers<[1], [0], [0], [1], [0, 0, 1, 1], [], []>} : vector<8x128xf32>, vector<128x128xf32>, vector<8x128xf32> -> vector<8x128xf32>
    %297 = arith.addf %296, %10 : vector<8x128xf32>
    %cst_131 = arith.constant 5.000000e-01 : f32
    %298 = vector.broadcast %cst_131 : f32 to vector<8x128xf32>
    %299 = arith.mulf %298, %253 : vector<8x128xf32>
    %300 = arith.addf %299, %297 : vector<8x128xf32>
    %cst_132 = arith.constant 1.000000e+00 : f32
    %301 = vector.broadcast %cst_132 : f32 to vector<8x128xf32>
    %302 = arith.cmpf ogt, %253, %301 : vector<8x128xf32>
    %cst_133 = arith.constant 1.000000e+00 : f32
    %cst_134 = arith.constant 0.000000e+00 : f32
    %303 = vector.broadcast %cst_133 : f32 to vector<8x128xf32>
    %304 = vector.broadcast %cst_134 : f32 to vector<8x128xf32>
    %305 = arith.select %302, %303, %304 : vector<8x128xi1>, vector<8x128xf32>
    %306 = arith.subf %300, %305 : vector<8x128xf32>
    %cst_135 = arith.constant 1.000000e+00 : f32
    %307 = vector.broadcast %cst_135 : f32 to vector<8x128xf32>
    %308 = arith.cmpf ogt, %306, %307 : vector<8x128xf32>
    %309 = arith.extui %293 : vector<8x128xi1> to vector<8x128xi32>
    %310 = arith.sitofp %309 : vector<8x128xi32> to vector<8x128xf32>
    %311 = arith.truncf %310 : vector<8x128xf32> to vector<8x128xbf16>
    %312 = arith.index_cast %c5_i32 : i32 to index
    %c0_136 = arith.constant 0 : index
    %c0_137 = arith.constant 0 : index
    %313 = vector.load %arg7[%312, %c0_136, %c0_137] : memref<8x8x128xbf16, #tpu.memory_space<vmem>>, vector<1x8x128xbf16>
    %314 = vector.shape_cast %313 : vector<1x8x128xbf16> to vector<8x128xbf16>
    %315 = vector.shape_cast %311 : vector<8x128xbf16> to vector<1x8x128xbf16>
    tpu.vector_store %arg7[%312, %c0_136, %c0_137], %315 {strides = array<i32>} : memref<8x8x128xbf16, #tpu.memory_space<vmem>>, vector<1x8x128xbf16>,
    %316 = arith.index_cast %c5_i32 : i32 to index
    %c0_138 = arith.constant 0 : index
    %c0_139 = arith.constant 0 : index
    %317 = vector.load %arg8[%316, %c0_138, %c0_139] : memref<8x8x128xf32, #tpu.memory_space<vmem>>, vector<1x8x128xf32>
    %318 = vector.shape_cast %317 : vector<1x8x128xf32> to vector<8x128xf32>
    %319 = vector.shape_cast %291 : vector<8x128xf32> to vector<1x8x128xf32>
    tpu.vector_store %arg8[%316, %c0_138, %c0_139], %319 {strides = array<i32>} : memref<8x8x128xf32, #tpu.memory_space<vmem>>, vector<1x8x128xf32>,
    %320 = arith.extui %308 : vector<8x128xi1> to vector<8x128xi32>
    %321 = arith.sitofp %320 : vector<8x128xi32> to vector<8x128xf32>
    %322 = arith.truncf %321 : vector<8x128xf32> to vector<8x128xbf16>
    %323 = arith.index_cast %c5_i32 : i32 to index
    %c0_140 = arith.constant 0 : index
    %c0_141 = arith.constant 0 : index
    %324 = vector.load %arg9[%323, %c0_140, %c0_141] : memref<8x8x128xbf16, #tpu.memory_space<vmem>>, vector<1x8x128xbf16>
    %325 = vector.shape_cast %324 : vector<1x8x128xbf16> to vector<8x128xbf16>
    %326 = vector.shape_cast %322 : vector<8x128xbf16> to vector<1x8x128xbf16>
    tpu.vector_store %arg9[%323, %c0_140, %c0_141], %326 {strides = array<i32>} : memref<8x8x128xbf16, #tpu.memory_space<vmem>>, vector<1x8x128xbf16>,
    %327 = arith.index_cast %c5_i32 : i32 to index
    %c0_142 = arith.constant 0 : index
    %c0_143 = arith.constant 0 : index
    %328 = vector.load %arg10[%327, %c0_142, %c0_143] : memref<8x8x128xf32, #tpu.memory_space<vmem>>, vector<1x8x128xf32>
    %329 = vector.shape_cast %328 : vector<1x8x128xf32> to vector<8x128xf32>
    %330 = vector.shape_cast %306 : vector<8x128xf32> to vector<1x8x128xf32>
    tpu.vector_store %arg10[%327, %c0_142, %c0_143], %330 {strides = array<i32>} : memref<8x8x128xf32, #tpu.memory_space<vmem>>, vector<1x8x128xf32>,
    %c6_i32 = arith.constant 6 : i32
    %331 = arith.index_cast %c6_i32 : i32 to index
    %c0_144 = arith.constant 0 : index
    %c0_145 = arith.constant 0 : index
    %332 = vector.load %arg2[%331, %c0_144, %c0_145] : memref<8x8x2xf32, #tpu.memory_space<vmem>>, vector<1x8x2xf32>
    %333 = vector.shape_cast %332 : vector<1x8x2xf32> to vector<8x2xf32>
    %cst_146 = arith.constant dense<0.000000e+00> : vector<8x128xf32>
    %334 = tpu.matmul %333, %3, %cst_146 {dimension_numbers = #tpu.dot_dimension_numbers<[1], [0], [0], [1], [0, 0, 1, 1], [], []>} : vector<8x2xf32>, vector<2x128xf32>, vector<8x128xf32> -> vector<8x128xf32>
    %335 = arith.addf %334, %7 : vector<8x128xf32>
    %cst_147 = arith.constant 5.000000e-01 : f32
    %336 = vector.broadcast %cst_147 : f32 to vector<8x128xf32>
    %337 = arith.mulf %336, %291 : vector<8x128xf32>
    %338 = arith.addf %337, %335 : vector<8x128xf32>
    %cst_148 = arith.constant 1.000000e+00 : f32
    %339 = vector.broadcast %cst_148 : f32 to vector<8x128xf32>
    %340 = arith.cmpf ogt, %291, %339 : vector<8x128xf32>
    %cst_149 = arith.constant 1.000000e+00 : f32
    %cst_150 = arith.constant 0.000000e+00 : f32
    %341 = vector.broadcast %cst_149 : f32 to vector<8x128xf32>
    %342 = vector.broadcast %cst_150 : f32 to vector<8x128xf32>
    %343 = arith.select %340, %341, %342 : vector<8x128xi1>, vector<8x128xf32>
    %344 = arith.subf %338, %343 : vector<8x128xf32>
    %cst_151 = arith.constant 1.000000e+00 : f32
    %345 = vector.broadcast %cst_151 : f32 to vector<8x128xf32>
    %346 = arith.cmpf ogt, %344, %345 : vector<8x128xf32>
    %347 = arith.extui %346 : vector<8x128xi1> to vector<8x128xi32>
    %348 = arith.sitofp %347 : vector<8x128xi32> to vector<8x128xf32>
    %cst_152 = arith.constant dense<0.000000e+00> : vector<8x128xf32>
    %349 = tpu.matmul %348, %4, %cst_152 {dimension_numbers = #tpu.dot_dimension_numbers<[1], [0], [0], [1], [0, 0, 1, 1], [], []>} : vector<8x128xf32>, vector<128x128xf32>, vector<8x128xf32> -> vector<8x128xf32>
    %350 = arith.addf %349, %10 : vector<8x128xf32>
    %cst_153 = arith.constant 5.000000e-01 : f32
    %351 = vector.broadcast %cst_153 : f32 to vector<8x128xf32>
    %352 = arith.mulf %351, %306 : vector<8x128xf32>
    %353 = arith.addf %352, %350 : vector<8x128xf32>
    %cst_154 = arith.constant 1.000000e+00 : f32
    %354 = vector.broadcast %cst_154 : f32 to vector<8x128xf32>
    %355 = arith.cmpf ogt, %306, %354 : vector<8x128xf32>
    %cst_155 = arith.constant 1.000000e+00 : f32
    %cst_156 = arith.constant 0.000000e+00 : f32
    %356 = vector.broadcast %cst_155 : f32 to vector<8x128xf32>
    %357 = vector.broadcast %cst_156 : f32 to vector<8x128xf32>
    %358 = arith.select %355, %356, %357 : vector<8x128xi1>, vector<8x128xf32>
    %359 = arith.subf %353, %358 : vector<8x128xf32>
    %cst_157 = arith.constant 1.000000e+00 : f32
    %360 = vector.broadcast %cst_157 : f32 to vector<8x128xf32>
    %361 = arith.cmpf ogt, %359, %360 : vector<8x128xf32>
    %362 = arith.extui %346 : vector<8x128xi1> to vector<8x128xi32>
    %363 = arith.sitofp %362 : vector<8x128xi32> to vector<8x128xf32>
    %364 = arith.truncf %363 : vector<8x128xf32> to vector<8x128xbf16>
    %365 = arith.index_cast %c6_i32 : i32 to index
    %c0_158 = arith.constant 0 : index
    %c0_159 = arith.constant 0 : index
    %366 = vector.load %arg7[%365, %c0_158, %c0_159] : memref<8x8x128xbf16, #tpu.memory_space<vmem>>, vector<1x8x128xbf16>
    %367 = vector.shape_cast %366 : vector<1x8x128xbf16> to vector<8x128xbf16>
    %368 = vector.shape_cast %364 : vector<8x128xbf16> to vector<1x8x128xbf16>
    tpu.vector_store %arg7[%365, %c0_158, %c0_159], %368 {strides = array<i32>} : memref<8x8x128xbf16, #tpu.memory_space<vmem>>, vector<1x8x128xbf16>,
    %369 = arith.index_cast %c6_i32 : i32 to index
    %c0_160 = arith.constant 0 : index
    %c0_161 = arith.constant 0 : index
    %370 = vector.load %arg8[%369, %c0_160, %c0_161] : memref<8x8x128xf32, #tpu.memory_space<vmem>>, vector<1x8x128xf32>
    %371 = vector.shape_cast %370 : vector<1x8x128xf32> to vector<8x128xf32>
    %372 = vector.shape_cast %344 : vector<8x128xf32> to vector<1x8x128xf32>
    tpu.vector_store %arg8[%369, %c0_160, %c0_161], %372 {strides = array<i32>} : memref<8x8x128xf32, #tpu.memory_space<vmem>>, vector<1x8x128xf32>,
    %373 = arith.extui %361 : vector<8x128xi1> to vector<8x128xi32>
    %374 = arith.sitofp %373 : vector<8x128xi32> to vector<8x128xf32>
    %375 = arith.truncf %374 : vector<8x128xf32> to vector<8x128xbf16>
    %376 = arith.index_cast %c6_i32 : i32 to index
    %c0_162 = arith.constant 0 : index
    %c0_163 = arith.constant 0 : index
    %377 = vector.load %arg9[%376, %c0_162, %c0_163] : memref<8x8x128xbf16, #tpu.memory_space<vmem>>, vector<1x8x128xbf16>
    %378 = vector.shape_cast %377 : vector<1x8x128xbf16> to vector<8x128xbf16>
    %379 = vector.shape_cast %375 : vector<8x128xbf16> to vector<1x8x128xbf16>
    tpu.vector_store %arg9[%376, %c0_162, %c0_163], %379 {strides = array<i32>} : memref<8x8x128xbf16, #tpu.memory_space<vmem>>, vector<1x8x128xbf16>,
    %380 = arith.index_cast %c6_i32 : i32 to index
    %c0_164 = arith.constant 0 : index
    %c0_165 = arith.constant 0 : index
    %381 = vector.load %arg10[%380, %c0_164, %c0_165] : memref<8x8x128xf32, #tpu.memory_space<vmem>>, vector<1x8x128xf32>
    %382 = vector.shape_cast %381 : vector<1x8x128xf32> to vector<8x128xf32>
    %383 = vector.shape_cast %359 : vector<8x128xf32> to vector<1x8x128xf32>
    tpu.vector_store %arg10[%380, %c0_164, %c0_165], %383 {strides = array<i32>} : memref<8x8x128xf32, #tpu.memory_space<vmem>>, vector<1x8x128xf32>,
    %c7_i32 = arith.constant 7 : i32
    %384 = arith.index_cast %c7_i32 : i32 to index
    %c0_166 = arith.constant 0 : index
    %c0_167 = arith.constant 0 : index
    %385 = vector.load %arg2[%384, %c0_166, %c0_167] : memref<8x8x2xf32, #tpu.memory_space<vmem>>, vector<1x8x2xf32>
    %386 = vector.shape_cast %385 : vector<1x8x2xf32> to vector<8x2xf32>
    %cst_168 = arith.constant dense<0.000000e+00> : vector<8x128xf32>
    %387 = tpu.matmul %386, %3, %cst_168 {dimension_numbers = #tpu.dot_dimension_numbers<[1], [0], [0], [1], [0, 0, 1, 1], [], []>} : vector<8x2xf32>, vector<2x128xf32>, vector<8x128xf32> -> vector<8x128xf32>
    %388 = arith.addf %387, %7 : vector<8x128xf32>
    %cst_169 = arith.constant 5.000000e-01 : f32
    %389 = vector.broadcast %cst_169 : f32 to vector<8x128xf32>
    %390 = arith.mulf %389, %344 : vector<8x128xf32>
    %391 = arith.addf %390, %388 : vector<8x128xf32>
    %cst_170 = arith.constant 1.000000e+00 : f32
    %392 = vector.broadcast %cst_170 : f32 to vector<8x128xf32>
    %393 = arith.cmpf ogt, %344, %392 : vector<8x128xf32>
    %cst_171 = arith.constant 1.000000e+00 : f32
    %cst_172 = arith.constant 0.000000e+00 : f32
    %394 = vector.broadcast %cst_171 : f32 to vector<8x128xf32>
    %395 = vector.broadcast %cst_172 : f32 to vector<8x128xf32>
    %396 = arith.select %393, %394, %395 : vector<8x128xi1>, vector<8x128xf32>
    %397 = arith.subf %391, %396 : vector<8x128xf32>
    %cst_173 = arith.constant 1.000000e+00 : f32
    %398 = vector.broadcast %cst_173 : f32 to vector<8x128xf32>
    %399 = arith.cmpf ogt, %397, %398 : vector<8x128xf32>
    %400 = arith.extui %399 : vector<8x128xi1> to vector<8x128xi32>
    %401 = arith.sitofp %400 : vector<8x128xi32> to vector<8x128xf32>
    %cst_174 = arith.constant dense<0.000000e+00> : vector<8x128xf32>
    %402 = tpu.matmul %401, %4, %cst_174 {dimension_numbers = #tpu.dot_dimension_numbers<[1], [0], [0], [1], [0, 0, 1, 1], [], []>} : vector<8x128xf32>, vector<128x128xf32>, vector<8x128xf32> -> vector<8x128xf32>
    %403 = arith.addf %402, %10 : vector<8x128xf32>
    %cst_175 = arith.constant 5.000000e-01 : f32
    %404 = vector.broadcast %cst_175 : f32 to vector<8x128xf32>
    %405 = arith.mulf %404, %359 : vector<8x128xf32>
    %406 = arith.addf %405, %403 : vector<8x128xf32>
    %cst_176 = arith.constant 1.000000e+00 : f32
    %407 = vector.broadcast %cst_176 : f32 to vector<8x128xf32>
    %408 = arith.cmpf ogt, %359, %407 : vector<8x128xf32>
    %cst_177 = arith.constant 1.000000e+00 : f32
    %cst_178 = arith.constant 0.000000e+00 : f32
    %409 = vector.broadcast %cst_177 : f32 to vector<8x128xf32>
    %410 = vector.broadcast %cst_178 : f32 to vector<8x128xf32>
    %411 = arith.select %408, %409, %410 : vector<8x128xi1>, vector<8x128xf32>
    %412 = arith.subf %406, %411 : vector<8x128xf32>
    %cst_179 = arith.constant 1.000000e+00 : f32
    %413 = vector.broadcast %cst_179 : f32 to vector<8x128xf32>
    %414 = arith.cmpf ogt, %412, %413 : vector<8x128xf32>
    %415 = arith.extui %399 : vector<8x128xi1> to vector<8x128xi32>
    %416 = arith.sitofp %415 : vector<8x128xi32> to vector<8x128xf32>
    %417 = arith.truncf %416 : vector<8x128xf32> to vector<8x128xbf16>
    %418 = arith.index_cast %c7_i32 : i32 to index
    %c0_180 = arith.constant 0 : index
    %c0_181 = arith.constant 0 : index
    %419 = vector.load %arg7[%418, %c0_180, %c0_181] : memref<8x8x128xbf16, #tpu.memory_space<vmem>>, vector<1x8x128xbf16>
    %420 = vector.shape_cast %419 : vector<1x8x128xbf16> to vector<8x128xbf16>
    %421 = vector.shape_cast %417 : vector<8x128xbf16> to vector<1x8x128xbf16>
    tpu.vector_store %arg7[%418, %c0_180, %c0_181], %421 {strides = array<i32>} : memref<8x8x128xbf16, #tpu.memory_space<vmem>>, vector<1x8x128xbf16>,
    %422 = arith.index_cast %c7_i32 : i32 to index
    %c0_182 = arith.constant 0 : index
    %c0_183 = arith.constant 0 : index
    %423 = vector.load %arg8[%422, %c0_182, %c0_183] : memref<8x8x128xf32, #tpu.memory_space<vmem>>, vector<1x8x128xf32>
    %424 = vector.shape_cast %423 : vector<1x8x128xf32> to vector<8x128xf32>
    %425 = vector.shape_cast %397 : vector<8x128xf32> to vector<1x8x128xf32>
    tpu.vector_store %arg8[%422, %c0_182, %c0_183], %425 {strides = array<i32>} : memref<8x8x128xf32, #tpu.memory_space<vmem>>, vector<1x8x128xf32>,
    %426 = arith.extui %414 : vector<8x128xi1> to vector<8x128xi32>
    %427 = arith.sitofp %426 : vector<8x128xi32> to vector<8x128xf32>
    %428 = arith.truncf %427 : vector<8x128xf32> to vector<8x128xbf16>
    %429 = arith.index_cast %c7_i32 : i32 to index
    %c0_184 = arith.constant 0 : index
    %c0_185 = arith.constant 0 : index
    %430 = vector.load %arg9[%429, %c0_184, %c0_185] : memref<8x8x128xbf16, #tpu.memory_space<vmem>>, vector<1x8x128xbf16>
    %431 = vector.shape_cast %430 : vector<1x8x128xbf16> to vector<8x128xbf16>
    %432 = vector.shape_cast %428 : vector<8x128xbf16> to vector<1x8x128xbf16>
    tpu.vector_store %arg9[%429, %c0_184, %c0_185], %432 {strides = array<i32>} : memref<8x8x128xbf16, #tpu.memory_space<vmem>>, vector<1x8x128xbf16>,
    %433 = arith.index_cast %c7_i32 : i32 to index
    %c0_186 = arith.constant 0 : index
    %c0_187 = arith.constant 0 : index
    %434 = vector.load %arg10[%433, %c0_186, %c0_187] : memref<8x8x128xf32, #tpu.memory_space<vmem>>, vector<1x8x128xf32>
    %435 = vector.shape_cast %434 : vector<1x8x128xf32> to vector<8x128xf32>
    %436 = vector.shape_cast %412 : vector<8x128xf32> to vector<1x8x128xf32>
    tpu.vector_store %arg10[%433, %c0_186, %c0_187], %436 {strides = array<i32>} : memref<8x8x128xf32, #tpu.memory_space<vmem>>, vector<1x8x128xf32>,
    %c8_i32 = arith.constant 8 : i32
    %c0_188 = arith.constant 0 : index
    %c0_189 = arith.constant 0 : index
    %437 = vector.load %arg11[%c0_188, %c0_189] : memref<8x128xf32, #tpu.memory_space<vmem>>, vector<8x128xf32>
    tpu.vector_store %arg11[%c0_188, %c0_189], %397 {strides = array<i32>} : memref<8x128xf32, #tpu.memory_space<vmem>>, vector<8x128xf32>,
    %c0_190 = arith.constant 0 : index
    %c0_191 = arith.constant 0 : index
    %438 = vector.load %arg12[%c0_190, %c0_191] : memref<8x128xf32, #tpu.memory_space<vmem>>, vector<8x128xf32>
    tpu.vector_store %arg12[%c0_190, %c0_191], %412 {strides = array<i32>} : memref<8x128xf32, #tpu.memory_space<vmem>>, vector<8x128xf32>,
    return
  }
  func.func @transform_0(%arg0: i32, %arg1: i32) -> (i32, i32, i32) {
    %c0_i32 = arith.constant 0 : i32
    %c0_i32_0 = arith.constant 0 : i32
    return %arg1, %arg0, %c0_i32 : i32, i32, i32
  }
  func.func @transform_1(%arg0: i32, %arg1: i32) -> (i32, i32) {
    %c0_i32 = arith.constant 0 : i32
    %c0_i32_0 = arith.constant 0 : i32
    %c0_i32_1 = arith.constant 0 : i32
    return %c0_i32, %c0_i32_0 : i32, i32
  }
  func.func @transform_2(%arg0: i32, %arg1: i32) -> (i32, i32) {
    %c0_i32 = arith.constant 0 : i32
    %c0_i32_0 = arith.constant 0 : i32
    %c0_i32_1 = arith.constant 0 : i32
    return %c0_i32, %c0_i32_0 : i32, i32
  }
  func.func @transform_3(%arg0: i32, %arg1: i32) -> (i32, i32) {
    %c0_i32 = arith.constant 0 : i32
    %c0_i32_0 = arith.constant 0 : i32
    %c0_i32_1 = arith.constant 0 : i32
    return %c0_i32, %c0_i32_0 : i32, i32
  }
  func.func @transform_4(%arg0: i32, %arg1: i32) -> (i32, i32) {
    %c0_i32 = arith.constant 0 : i32
    %c0_i32_0 = arith.constant 0 : i32
    %c0_i32_1 = arith.constant 0 : i32
    return %c0_i32, %c0_i32_0 : i32, i32
  }
  func.func @transform_5(%arg0: i32, %arg1: i32) -> (i32, i32, i32) {
    %c0_i32 = arith.constant 0 : i32
    %c0_i32_0 = arith.constant 0 : i32
    return %arg1, %arg0, %c0_i32 : i32, i32, i32
  }
  func.func @transform_6(%arg0: i32, %arg1: i32) -> (i32, i32, i32) {
    %c0_i32 = arith.constant 0 : i32
    %c0_i32_0 = arith.constant 0 : i32
    return %arg1, %arg0, %c0_i32 : i32, i32, i32
  }
  func.func @transform_7(%arg0: i32, %arg1: i32) -> (i32, i32, i32) {
    %c0_i32 = arith.constant 0 : i32
    %c0_i32_0 = arith.constant 0 : i32
    return %arg1, %arg0, %c0_i32 : i32, i32, i32
  }
  func.func @transform_8(%arg0: i32, %arg1: i32) -> (i32, i32, i32) {
    %c0_i32 = arith.constant 0 : i32
    %c0_i32_0 = arith.constant 0 : i32
    return %arg1, %arg0, %c0_i32 : i32, i32, i32
  }
}

</mosaic_0001>

<bundles_post_ra>
// kernel: snn_forward.1
= control target key start
LH: loop header
LB: loop body
LE: loop exit
PB: predicated region body
PF: predicated region fallthrough
CT: control target
= control target key end

     0   :  { %vm68_vm0 = vcmask 1041408   ;;  %vm64_vm1 = vcmask 15360   ;;  %v2180_v0 = vmov 0.0   ;;  %vm2181_vm2 = vmmov 0   ;;  %s2670_s1 = inlined_call_operand.vmem [shape: f32[2,128], index: 1, kind: input, shape index: {}]   ;;  %s2671_s0 = inlined_call_operand.vmem [shape: f32[8,8,2], index: 0, kind: input, shape index: {}]   ;;  %s2672_s3 = inlined_call_operand.vmem [shape: f32[128,128], index: 3, kind: input, shape index: {}]   ;;  %s2673_s2 = inlined_call_operand.vmem [shape: f32[1,128], index: 2, kind: input, shape index: {}]   ;;  %s2674_s6 = inlined_call_operand.vmem [shape: f32[8,8,128], index: 6, kind: output, shape index: {1}]   ;;  %s2675_s5 = inlined_call_operand.vmem [shape: bf16[8,8,128], index: 5, kind: output, shape index: {0}]   ;;  %s2676_s4 = inlined_call_operand.vmem [shape: f32[1,128], index: 4, kind: input, shape index: {}]   ;;  %s2677_s8 = inlined_call_operand.vmem [shape: f32[8,8,128], index: 8, kind: output, shape index: {3}]   ;;  %s2678_s7 = inlined_call_operand.vmem [shape: bf16[8,8,128], index: 7, kind: output, shape index: {2}]  }
   0x1   :  { %1664 = vmatprep.subr.mxu1 %v2180_v0  ;;  %v2233_v1 = vld [vmem:[%s2670_s1] sm:$0x3]  ;;  %1666 = vmatprep.mubr.msk.f32.mxu1 %vm2181_vm2, %v2180_v0  ;;  %v1442_v3 = vld [vmem:[%s2671_s0 + $0x8] sm:$0xff]  ;;  %v33_v6 = vld [vmem:[%s2672_s3 + $0x10] sm:$0xff]  ;;  %v2182_v9 = vmov 0.0|0.0   ;;  %v2183_v38 = vmov 1.0  }
   0x2   :  { %v63_v2 = vld [vmem:[%s2671_s0] sm:$0xff]  ;;  %1665 = vmatpush3.msk.msra.mxu1 %vm68_vm0, %v2233_v1  ;;  %1704 = vmatprep.subr.mxu0 %v2180_v0  ;;  %v32_v5 = vld [vmem:[%s2672_s3 + $0x8] sm:$0xff]  ;;  %v34_v8 = vld [vmem:[%s2672_s3 + $0x18] sm:$0xff] }
   0x3   :  { %v31_v4 = vld [vmem:[%s2672_s3] sm:$0xff]  ;;  %1667 = vmatmul.mubr.msk.f32.vlgmr.msra.gmra.mrb[0].mxu1 %vm64_vm1, %v63_v2  ;;  %1705 = vmatpush3.msk.msra.mxu0 %vm68_vm0, %v2233_v1  ;;  %v2268_v10 = vpack.c.bf16 %v34_v8, %v33_v6  ;;  %v36_v12 = vld [vmem:[%s2672_s3 + $0x28] sm:$0xff]  ;;  %v37_v14 = vld [vmem:[%s2672_s3 + $0x30] sm:$0xff] }
   0x4   :  { %v2258_v7 = vpack.c.bf16 %v32_v5, %v31_v4  ;;  %1706 = vmatprep.mubr.msk.f32.mxu0 %vm2181_vm2, %v2180_v0  ;;  %1984 = vmatprep.subr.bf16.mxu1 %v2182_v9  ;;  %v35_v11 = vld [vmem:[%s2672_s3 + $0x20] sm:$0xff]  ;;  %v38_v15 = vld [vmem:[%s2672_s3 + $0x38] sm:$0xff]  ;;  %v40_v18 = vld [vmem:[%s2672_s3 + $0x48] sm:$0xff] }
   0x5   :  { %1707 = vmatmul.mubr.msk.f32.vlgmr.msra.gmra.mrb[0].mxu0 %vm64_vm1, %v1442_v3  ;;  %2008 = vmatprep.subr.bf16.mxu0 %v2182_v9  ;;  %v2285_v13 = vpack.c.bf16 %v36_v12, %v35_v11  ;;  %v2297_v16 = vpack.c.bf16 %v38_v15, %v37_v14  ;;  %v39_v17 = vld [vmem:[%s2672_s3 + $0x40] sm:$0xff]  ;;  %v41_v20 = vld [vmem:[%s2672_s3 + $0x50] sm:$0xff]  ;;  %v42_v21 = vld [vmem:[%s2672_s3 + $0x58] sm:$0xff] }
   0x6   :  { %1986 = vmatpush3.bf16.msra.mxu1 %v2258_v7  ;;  %2010 = vmatpush3.bf16.msra.mxu0 %v2258_v7  ;;  %v2309_v19 = vpack.c.bf16 %v40_v18, %v39_v17  ;;  %v2321_v22 = vpack.c.bf16 %v42_v21, %v41_v20  ;;  %v43_v23 = vld [vmem:[%s2672_s3 + $0x60] sm:$0xff]  ;;  %v44_v24 = vld [vmem:[%s2672_s3 + $0x68] sm:$0xff]  ;;  %v45_v26 = vld [vmem:[%s2672_s3 + $0x70] sm:$0xff] }
   0x7   :  { %1987 = vmatprep.subr.bf16.mxu1 %v2182_v9  ;;  %1701 = vmatprep.mubr.msk.f32.mxu1 %vm2181_vm2, %v2180_v0  ;;  %v2333_v25 = vpack.c.bf16 %v44_v24, %v43_v23  ;;  %v46_v27 = vld [vmem:[%s2672_s3 + $0x78] sm:$0xff]  ;;  %v2357_v29 = vld [vmem:[%s2673_s2] ss:$0 sm:$0xff]  ;;  %v1452_v41 = vld [vmem:[%s2671_s0 + $0x10] sm:$0xff] }
   0x8   :  { %2011 = vmatprep.subr.bf16.mxu0 %v2182_v9  ;;  %1741 = vmatprep.mubr.msk.f32.mxu0 %vm2181_vm2, %v2180_v0  ;;  %v2348_v28 = vpack.c.bf16 %v46_v27, %v45_v26  ;;  %v1462_v44 = vld [vmem:[%s2671_s0 + $0x18] sm:$0xff]  ;;  %v2434_v46 = vld [vmem:[%s2676_s4] ss:$0 sm:$0xff]  ;;  %v1482_v20 = vld [vmem:[%s2671_s0 + $0x28] sm:$0xff] }
   0x9   :  { %v1472_v12 = vld [vmem:[%s2671_s0 + $0x20] sm:$0xff] }
   0xa   :  { %1989 = vmatpush3.bf16.msra.mxu1 %v2268_v10  ;;  %2013 = vmatpush3.bf16.msra.mxu0 %v2268_v10 }
   0xb   :  { %1990 = vmatprep.subr.bf16.mxu1 %v2182_v9  ;;  %2014 = vmatprep.subr.bf16.mxu0 %v2182_v9 }
   0xe   :  { %1992 = vmatpush3.bf16.msra.mxu1 %v2285_v13  ;;  %2016 = vmatpush3.bf16.msra.mxu0 %v2285_v13 }
   0xf   :  { %1993 = vmatprep.subr.bf16.mxu1 %v2182_v9  ;;  %2017 = vmatprep.subr.bf16.mxu0 %v2182_v9 }
  0x12   :  { %1995 = vmatpush3.bf16.msra.mxu1 %v2297_v16  ;;  %2019 = vmatpush3.bf16.msra.mxu0 %v2297_v16 }
  0x13   :  { %1996 = vmatprep.subr.bf16.mxu1 %v2182_v9  ;;  %2020 = vmatprep.subr.bf16.mxu0 %v2182_v9 }
  0x16   :  { %1998 = vmatpush3.bf16.msra.mxu1 %v2309_v19  ;;  %2022 = vmatpush3.bf16.msra.mxu0 %v2309_v19 }
  0x17   :  { %1999 = vmatprep.subr.bf16.mxu1 %v2182_v9  ;;  %2023 = vmatprep.subr.bf16.mxu0 %v2182_v9 }
  0x1a   :  { %2001 = vmatpush3.bf16.msra.mxu1 %v2321_v22  ;;  %2025 = vmatpush3.bf16.msra.mxu0 %v2321_v22 }
  0x1b   :  { %2002 = vmatprep.subr.bf16.mxu1 %v2182_v9  ;;  %2026 = vmatprep.subr.bf16.mxu0 %v2182_v9 }
  0x1e   :  { %2004 = vmatpush3.bf16.msra.mxu1 %v2333_v25  ;;  %2028 = vmatpush3.bf16.msra.mxu0 %v2333_v25 }
  0x1f   :  { %2005 = vmatprep.subr.bf16.mxu1 %v2182_v9  ;;  %2029 = vmatprep.subr.bf16.mxu0 %v2182_v9 }
  0x22   :  { %2007 = vmatpush3.bf16.msra.mxu1 %v2348_v28  ;;  %2031 = vmatpush3.bf16.msra.mxu0 %v2348_v28 }
  0x23   :  { %1744 = vmatprep.subr.mxu1 %v2180_v0  ;;  %1784 = vmatprep.subr.mxu0 %v2180_v0 }
  0xd6   :  { %v138_v30 = vpop.f32.mrb[0].mxu1 }
  0xd7   :  { %v139_v31 = vadd.f32 %v2357_v29, %v138_v30  ;;  %v1668_v32 = vpop.f32.mrb[1].mxu1 }
  0xd8   :  { %v305_v33 = vpop.f32.mrb[0].mxu0 }
  0xd9   :  { %vm147_vm3 = vcmp.gt.f32.partialorder %v139_v31, 1.0  ;;  %228 = vst [vmem:[%s2674_s6] sm:$0xff] %v139_v31  ;;  %v306_v34 = vadd.f32 %v2357_v29, %v305_v33  ;;  %v309_v35 = vmul.f32 0.5, %v139_v31  ;;  %v1708_v36 = vpop.f32.mrb[1].mxu0 }
  0xda   :  { %v1439_v37 = vsel %vm147_vm3, 1.0, %v2180_v0  ;;  %1702 = vmatmul.mubr.msk.f32.vlgmr.msra.gmra.mrb[2].mxu1 %vm147_vm3, %v2183_v38 }
  0xdb   :  { %v226_v39 = vpack.c.bf16 %v1439_v37, %v1439_v37  ;;  %v310_v40 = vadd.f32 %v309_v35, %v306_v34  ;;  %1745 = vmatpush3.msk.msra.mxu1 %vm68_vm0, %v2233_v1  ;;  %1746 = vmatprep.mubr.msk.f32.mxu1 %vm2181_vm2, %v2180_v0 }
  0xdc   :  { %2032 = vmatprep.subr.bf16.mxu1 %v2182_v9 }
  0xdd   :  { %227 = vst [vmem:[%s2675_s5] sm:$0xf] %v226_v39  ;;  %v312_v42 = vsub.f32 %v310_v40, %v1439_v37 }
  0xde   :  { %1747 = vmatmul.mubr.msk.f32.vlgmr.msra.gmra.mrb[4].mxu1 %vm64_vm1, %v1452_v41 }
  0xdf   :  { %1448 = vst [vmem:[%s2674_s6 + $0x8] sm:$0xff] %v312_v42  ;;  %vm313_vm4 = vcmp.gt.f32.partialorder %v312_v42, 1.0  ;;  %2034 = vmatpush3.bf16.msra.mxu1 %v2258_v7  ;;  %1781 = vmatprep.mubr.msk.f32.mxu1 %vm2181_vm2, %v2180_v0  ;;  %v478_v53 = vmul.f32 0.5, %v312_v42 }
  0xe0   :  { %1742 = vmatmul.mubr.msk.f32.vlgmr.msra.gmra.mrb[2].mxu0 %vm313_vm4, %v2183_v38  ;;  %2035 = vmatprep.subr.bf16.mxu1 %v2182_v9  ;;  %v1445_v43 = vsel %vm313_vm4, 1.0, %v2180_v0 }
  0xe1   :  { %1785 = vmatpush3.msk.msra.mxu0 %vm68_vm0, %v2233_v1  ;;  %1786 = vmatprep.mubr.msk.f32.mxu0 %vm2181_vm2, %v2180_v0  ;;  %v391_v45 = vpack.c.bf16 %v1445_v43, %v1445_v43 }
  0xe2   :  { %2056 = vmatprep.subr.bf16.mxu0 %v2182_v9 }
  0xe3   :  { %2037 = vmatpush3.bf16.msra.mxu1 %v2268_v10  ;;  %1447 = vst [vmem:[%s2675_s5 + $0x4] sm:$0xf] %v391_v45 }
  0xe4   :  { %1787 = vmatmul.mubr.msk.f32.vlgmr.msra.gmra.mrb[4].mxu0 %vm64_vm1, %v1462_v44  ;;  %2038 = vmatprep.subr.bf16.mxu1 %v2182_v9 }
  0xe5   :  { %2058 = vmatpush3.bf16.msra.mxu0 %v2258_v7  ;;  %1821 = vmatprep.mubr.msk.f32.mxu0 %vm2181_vm2, %v2180_v0 }
  0xe6   :  { %2059 = vmatprep.subr.bf16.mxu0 %v2182_v9 }
  0xe7   :  { %2040 = vmatpush3.bf16.msra.mxu1 %v2285_v13 }
  0xe8   :  { %2041 = vmatprep.subr.bf16.mxu1 %v2182_v9 }
  0xe9   :  { %2061 = vmatpush3.bf16.msra.mxu0 %v2268_v10 }
  0xea   :  { %2062 = vmatprep.subr.bf16.mxu0 %v2182_v9 }
  0xeb   :  { %2043 = vmatpush3.bf16.msra.mxu1 %v2297_v16 }
  0xec   :  { %2044 = vmatprep.subr.bf16.mxu1 %v2182_v9 }
  0xed   :  { %2064 = vmatpush3.bf16.msra.mxu0 %v2285_v13 }
  0xee   :  { %2065 = vmatprep.subr.bf16.mxu0 %v2182_v9 }
  0xef   :  { %2046 = vmatpush3.bf16.msra.mxu1 %v2309_v19 }
  0xf0   :  { %2047 = vmatprep.subr.bf16.mxu1 %v2182_v9 }
  0xf1   :  { %2067 = vmatpush3.bf16.msra.mxu0 %v2297_v16 }
  0xf2   :  { %2068 = vmatprep.subr.bf16.mxu0 %v2182_v9 }
  0xf3   :  { %2049 = vmatpush3.bf16.msra.mxu1 %v2321_v22 }
  0xf4   :  { %2050 = vmatprep.subr.bf16.mxu1 %v2182_v9 }
  0xf5   :  { %2070 = vmatpush3.bf16.msra.mxu0 %v2309_v19 }
  0xf6   :  { %2071 = vmatprep.subr.bf16.mxu0 %v2182_v9 }
  0xf7   :  { %2052 = vmatpush3.bf16.msra.mxu1 %v2333_v25 }
  0xf8   :  { %2053 = vmatprep.subr.bf16.mxu1 %v2182_v9 }
  0xf9   :  { %2073 = vmatpush3.bf16.msra.mxu0 %v2321_v22 }
  0xfa   :  { %2074 = vmatprep.subr.bf16.mxu0 %v2182_v9 }
  0xfb   :  { %2055 = vmatpush3.bf16.msra.mxu1 %v2348_v28 }
  0xfc   :  { %1824 = vmatprep.subr.mxu1 %v2180_v0 }
  0xfd   :  { %2076 = vmatpush3.bf16.msra.mxu0 %v2333_v25 }
  0xfe   :  { %2077 = vmatprep.subr.bf16.mxu0 %v2182_v9 }
 0x101   :  { %2079 = vmatpush3.bf16.msra.mxu0 %v2348_v28 }
 0x102   :  { %1864 = vmatprep.subr.mxu0 %v2180_v0 }
 0x1ad   :  { %v216_v47 = vpop.f32.mrb[2].mxu1 }
 0x1ae   :  { %v217_v48 = vadd.f32 %v2434_v46, %v216_v47  ;;  %v1703_v49 = vpop.f32.mrb[3].mxu1 }
 0x1b0   :  { %vm225_vm5 = vcmp.gt.f32.partialorder %v217_v48, 1.0  ;;  %233 = vst [vmem:[%s2677_s8] sm:$0xff] %v217_v48  ;;  %v386_v59 = vmul.f32 0.5, %v217_v48 }
 0x1b1   :  { %v474_v50 = vpop.f32.mrb[4].mxu1  ;;  %v1441_v51 = vsel %vm225_vm5, 1.0, %v2180_v0 }
 0x1b2   :  { %v475_v52 = vadd.f32 %v2357_v29, %v474_v50  ;;  %v1748_v54 = vpop.f32.mrb[5].mxu1  ;;  %v231_v55 = vpack.c.bf16 %v1441_v51, %v1441_v51 }
 0x1b3   :  { %v382_v56 = vpop.f32.mrb[2].mxu0 }
 0x1b4   :  { %v479_v57 = vadd.f32 %v478_v53, %v475_v52  ;;  %232 = vst [vmem:[%s2678_s7] sm:$0xf] %v231_v55  ;;  %v383_v58 = vadd.f32 %v2434_v46, %v382_v56  ;;  %v1743_v60 = vpop.f32.mrb[3].mxu0  ;;  %v1492_v55 = vld [vmem:[%s2671_s0 + $0x30] sm:$0xff] }
 0x1b5   :  { %v1502_v60 = vld [vmem:[%s2671_s0 + $0x38] sm:$0xff] }
 0x1b6   :  { %v481_v61 = vsub.f32 %v479_v57, %v1445_v43  ;;  %v387_v62 = vadd.f32 %v386_v59, %v383_v58 }
 0x1b7   :  { %v643_v63 = vpop.f32.mrb[4].mxu0 }
 0x1b8   :  { %1458 = vst [vmem:[%s2674_s6 + $0x10] sm:$0xff] %v481_v61  ;;  %v2449_v2 = vsub.f32 %v387_v62, %v1441_v51  ;;  %vm482_vm6 = vcmp.gt.f32.partialorder %v481_v61, 1.0  ;;  %v644_v3 = vadd.f32 %v2357_v29, %v643_v63  ;;  %v647_v4 = vmul.f32 0.5, %v481_v61  ;;  %v1788_v5 = vpop.f32.mrb[5].mxu0 }
 0x1b9   :  { %v1455_v6 = vsel %vm482_vm6, 1.0, %v2180_v0  ;;  %1782 = vmatmul.mubr.msk.f32.vlgmr.msra.gmra.mrb[6].mxu1 %vm482_vm6, %v2183_v38 }
 0x1ba   :  { %1451 = vst [vmem:[%s2677_s8 + $0x8] sm:$0xff] %v2449_v2  ;;  %v560_v8 = vpack.c.bf16 %v1455_v6, %v1455_v6  ;;  %v648_v11 = vadd.f32 %v647_v4, %v644_v3  ;;  %1825 = vmatpush3.msk.msra.mxu1 %vm68_vm0, %v2233_v1  ;;  %1826 = vmatprep.mubr.msk.f32.mxu1 %vm2181_vm2, %v2180_v0  ;;  %vm390_vm7 = vcmp.gt.f32.partialorder %v2449_v2, 1.0  ;;  %v555_v26 = vmul.f32 0.5, %v2449_v2 }
 0x1bb   :  { %2080 = vmatprep.subr.bf16.mxu1 %v2182_v9  ;;  %v1449_v14 = vsel %vm390_vm7, 1.0, %v2180_v0 }
 0x1bc   :  { %1457 = vst [vmem:[%s2675_s5 + $0x8] sm:$0xf] %v560_v8  ;;  %v650_v15 = vsub.f32 %v648_v11, %v1455_v6  ;;  %v398_v17 = vpack.c.bf16 %v1449_v14, %v1449_v14 }
 0x1bd   :  { %1827 = vmatmul.mubr.msk.f32.vlgmr.msra.gmra.mrb[8].mxu1 %vm64_vm1, %v1472_v12 }
 0x1be   :  { %1468 = vst [vmem:[%s2674_s6 + $0x18] sm:$0xff] %v650_v15  ;;  %vm651_vm8 = vcmp.gt.f32.partialorder %v650_v15, 1.0  ;;  %2082 = vmatpush3.bf16.msra.mxu1 %v2258_v7  ;;  %1450 = vst [vmem:[%s2678_s7 + $0x4] sm:$0xf] %v398_v17  ;;  %1861 = vmatprep.mubr.msk.f32.mxu1 %vm2181_vm2, %v2180_v0  ;;  %v816_v34 = vmul.f32 0.5, %v650_v15 }
 0x1bf   :  { %1822 = vmatmul.mubr.msk.f32.vlgmr.msra.gmra.mrb[6].mxu0 %vm651_vm8, %v2183_v38  ;;  %2083 = vmatprep.subr.bf16.mxu1 %v2182_v9  ;;  %v1465_v18 = vsel %vm651_vm8, 1.0, %v2180_v0 }
 0x1c0   :  { %1865 = vmatpush3.msk.msra.mxu0 %vm68_vm0, %v2233_v1  ;;  %1866 = vmatprep.mubr.msk.f32.mxu0 %vm2181_vm2, %v2180_v0  ;;  %v729_v21 = vpack.c.bf16 %v1465_v18, %v1465_v18 }
 0x1c1   :  { %2104 = vmatprep.subr.bf16.mxu0 %v2182_v9 }
 0x1c2   :  { %2085 = vmatpush3.bf16.msra.mxu1 %v2268_v10  ;;  %1467 = vst [vmem:[%s2675_s5 + $0xc] sm:$0xf] %v729_v21 }
 0x1c3   :  { %1867 = vmatmul.mubr.msk.f32.vlgmr.msra.gmra.mrb[8].mxu0 %vm64_vm1, %v1482_v20  ;;  %2086 = vmatprep.subr.bf16.mxu1 %v2182_v9 }
 0x1c4   :  { %2106 = vmatpush3.bf16.msra.mxu0 %v2258_v7  ;;  %1901 = vmatprep.mubr.msk.f32.mxu0 %vm2181_vm2, %v2180_v0 }
 0x1c5   :  { %2107 = vmatprep.subr.bf16.mxu0 %v2182_v9 }
 0x1c6   :  { %2088 = vmatpush3.bf16.msra.mxu1 %v2285_v13 }
 0x1c7   :  { %2089 = vmatprep.subr.bf16.mxu1 %v2182_v9 }
 0x1c8   :  { %2109 = vmatpush3.bf16.msra.mxu0 %v2268_v10 }
 0x1c9   :  { %2110 = vmatprep.subr.bf16.mxu0 %v2182_v9 }
 0x1ca   :  { %2091 = vmatpush3.bf16.msra.mxu1 %v2297_v16 }
 0x1cb   :  { %2092 = vmatprep.subr.bf16.mxu1 %v2182_v9 }
 0x1cc   :  { %2112 = vmatpush3.bf16.msra.mxu0 %v2285_v13 }
 0x1cd   :  { %2113 = vmatprep.subr.bf16.mxu0 %v2182_v9 }
 0x1ce   :  { %2094 = vmatpush3.bf16.msra.mxu1 %v2309_v19 }
 0x1cf   :  { %2095 = vmatprep.subr.bf16.mxu1 %v2182_v9 }
 0x1d0   :  { %2115 = vmatpush3.bf16.msra.mxu0 %v2297_v16 }
 0x1d1   :  { %2116 = vmatprep.subr.bf16.mxu0 %v2182_v9 }
 0x1d2   :  { %2097 = vmatpush3.bf16.msra.mxu1 %v2321_v22 }
 0x1d3   :  { %2098 = vmatprep.subr.bf16.mxu1 %v2182_v9 }
 0x1d4   :  { %2118 = vmatpush3.bf16.msra.mxu0 %v2309_v19 }
 0x1d5   :  { %2119 = vmatprep.subr.bf16.mxu0 %v2182_v9 }
 0x1d6   :  { %2100 = vmatpush3.bf16.msra.mxu1 %v2333_v25 }
 0x1d7   :  { %2101 = vmatprep.subr.bf16.mxu1 %v2182_v9 }
 0x1d8   :  { %2121 = vmatpush3.bf16.msra.mxu0 %v2321_v22 }
 0x1d9   :  { %2122 = vmatprep.subr.bf16.mxu0 %v2182_v9 }
 0x1da   :  { %2103 = vmatpush3.bf16.msra.mxu1 %v2348_v28 }
 0x1db   :  { %1904 = vmatprep.subr.mxu1 %v2180_v0 }
 0x1dc   :  { %2124 = vmatpush3.bf16.msra.mxu0 %v2333_v25 }
 0x1dd   :  { %2125 = vmatprep.subr.bf16.mxu0 %v2182_v9 }
 0x1e0   :  { %2127 = vmatpush3.bf16.msra.mxu0 %v2348_v28 }
 0x1e1   :  { %1944 = vmatprep.subr.mxu0 %v2180_v0 }
 0x28c   :  { %v551_v23 = vpop.f32.mrb[6].mxu1 }
 0x28d   :  { %v552_v24 = vadd.f32 %v2434_v46, %v551_v23  ;;  %v1783_v27 = vpop.f32.mrb[7].mxu1 }
 0x28f   :  { %v556_v30 = vadd.f32 %v555_v26, %v552_v24 }
 0x290   :  { %v812_v31 = vpop.f32.mrb[8].mxu1 }
 0x291   :  { %v558_v32 = vsub.f32 %v556_v30, %v1449_v14  ;;  %v813_v33 = vadd.f32 %v2357_v29, %v812_v31  ;;  %v1828_v35 = vpop.f32.mrb[9].mxu1 }
 0x292   :  { %v720_v36 = vpop.f32.mrb[6].mxu0 }
 0x293   :  { %1461 = vst [vmem:[%s2677_s8 + $0x10] sm:$0xff] %v558_v32  ;;  %v817_v37 = vadd.f32 %v816_v34, %v813_v33  ;;  %vm559_vm9 = vcmp.gt.f32.partialorder %v558_v32, 1.0  ;;  %v721_v39 = vadd.f32 %v2434_v46, %v720_v36  ;;  %v724_v40 = vmul.f32 0.5, %v558_v32  ;;  %v1823_v41 = vpop.f32.mrb[7].mxu0 }
 0x294   :  { %v1459_v42 = vsel %vm559_vm9, 1.0, %v2180_v0 }
 0x295   :  { %v819_v43 = vsub.f32 %v817_v37, %v1465_v18  ;;  %v567_v44 = vpack.c.bf16 %v1459_v42, %v1459_v42  ;;  %v725_v45 = vadd.f32 %v724_v40, %v721_v39 }
 0x296   :  { %v981_v47 = vpop.f32.mrb[8].mxu0 }
 0x297   :  { %1478 = vst [vmem:[%s2674_s6 + $0x20] sm:$0xff] %v819_v43  ;;  %1460 = vst [vmem:[%s2678_s7 + $0x8] sm:$0xf] %v567_v44  ;;  %v2542_v48 = vsub.f32 %v725_v45, %v1459_v42  ;;  %vm820_vm10 = vcmp.gt.f32.partialorder %v819_v43, 1.0  ;;  %v982_v49 = vadd.f32 %v2357_v29, %v981_v47  ;;  %v985_v50 = vmul.f32 0.5, %v819_v43  ;;  %v1868_v51 = vpop.f32.mrb[9].mxu0 }
 0x298   :  { %v1475_v52 = vsel %vm820_vm10, 1.0, %v2180_v0  ;;  %1862 = vmatmul.mubr.msk.f32.vlgmr.msra.gmra.mrb[10].mxu1 %vm820_vm10, %v2183_v38 }
 0x299   :  { %1471 = vst [vmem:[%s2677_s8 + $0x18] sm:$0xff] %v2542_v48  ;;  %v898_v53 = vpack.c.bf16 %v1475_v52, %v1475_v52  ;;  %v986_v54 = vadd.f32 %v985_v50, %v982_v49  ;;  %1905 = vmatpush3.msk.msra.mxu1 %vm68_vm0, %v2233_v1  ;;  %1906 = vmatprep.mubr.msk.f32.mxu1 %vm2181_vm2, %v2180_v0  ;;  %vm728_vm11 = vcmp.gt.f32.partialorder %v2542_v48, 1.0 }
 0x29a   :  { %2128 = vmatprep.subr.bf16.mxu1 %v2182_v9  ;;  %v1469_v56 = vsel %vm728_vm11, 1.0, %v2180_v0 }
 0x29b   :  { %1477 = vst [vmem:[%s2675_s5 + $0x10] sm:$0xf] %v898_v53  ;;  %v988_v57 = vsub.f32 %v986_v54, %v1475_v52  ;;  %v736_v58 = vpack.c.bf16 %v1469_v56, %v1469_v56 }
 0x29c   :  { %1907 = vmatmul.mubr.msk.f32.vlgmr.msra.gmra.mrb[12].mxu1 %vm64_vm1, %v1492_v55 }
 0x29d   :  { %1488 = vst [vmem:[%s2674_s6 + $0x28] sm:$0xff] %v988_v57  ;;  %vm989_vm12 = vcmp.gt.f32.partialorder %v988_v57, 1.0  ;;  %2130 = vmatpush3.bf16.msra.mxu1 %v2258_v7  ;;  %1470 = vst [vmem:[%s2678_s7 + $0xc] sm:$0xf] %v736_v58  ;;  %1941 = vmatprep.mubr.msk.f32.mxu1 %vm2181_vm2, %v2180_v0  ;;  %v1154_v63 = vmul.f32 0.5, %v988_v57 }
 0x29e   :  { %1902 = vmatmul.mubr.msk.f32.vlgmr.msra.gmra.mrb[10].mxu0 %vm989_vm12, %v2183_v38  ;;  %2131 = vmatprep.subr.bf16.mxu1 %v2182_v9  ;;  %v1485_v59 = vsel %vm989_vm12, 1.0, %v2180_v0 }
 0x29f   :  { %1945 = vmatpush3.msk.msra.mxu0 %vm68_vm0, %v2233_v1  ;;  %1946 = vmatprep.mubr.msk.f32.mxu0 %vm2181_vm2, %v2180_v0  ;;  %v1067_v61 = vpack.c.bf16 %v1485_v59, %v1485_v59 }
 0x2a0   :  { %2152 = vmatprep.subr.bf16.mxu0 %v2182_v9 }
 0x2a1   :  { %2133 = vmatpush3.bf16.msra.mxu1 %v2268_v10  ;;  %1487 = vst [vmem:[%s2675_s5 + $0x14] sm:$0xf] %v1067_v61 }
 0x2a2   :  { %1947 = vmatmul.mubr.msk.f32.vlgmr.msra.gmra.mrb[12].mxu0 %vm64_vm1, %v1502_v60  ;;  %2134 = vmatprep.subr.bf16.mxu1 %v2182_v9 }
 0x2a3   :  { %2154 = vmatpush3.bf16.msra.mxu0 %v2258_v7  ;;  %1981 = vmatprep.mubr.msk.f32.mxu0 %vm2181_vm2, %v2180_v0 }
 0x2a4   :  { %2155 = vmatprep.subr.bf16.mxu0 %v2182_v9 }
 0x2a5   :  { %2136 = vmatpush3.bf16.msra.mxu1 %v2285_v13 }
 0x2a6   :  { %2137 = vmatprep.subr.bf16.mxu1 %v2182_v9 }
 0x2a7   :  { %2157 = vmatpush3.bf16.msra.mxu0 %v2268_v10  ;;  %v893_v10 = vmul.f32 0.5, %v2542_v48 }
 0x2a8   :  { %2158 = vmatprep.subr.bf16.mxu0 %v2182_v9 }
 0x2a9   :  { %2139 = vmatpush3.bf16.msra.mxu1 %v2297_v16 }
 0x2aa   :  { %2140 = vmatprep.subr.bf16.mxu1 %v2182_v9 }
 0x2ab   :  { %2160 = vmatpush3.bf16.msra.mxu0 %v2285_v13 }
 0x2ac   :  { %2161 = vmatprep.subr.bf16.mxu0 %v2182_v9 }
 0x2ad   :  { %2142 = vmatpush3.bf16.msra.mxu1 %v2309_v19 }
 0x2ae   :  { %2143 = vmatprep.subr.bf16.mxu1 %v2182_v9 }
 0x2af   :  { %2163 = vmatpush3.bf16.msra.mxu0 %v2297_v16 }
 0x2b0   :  { %2164 = vmatprep.subr.bf16.mxu0 %v2182_v9 }
 0x2b1   :  { %2145 = vmatpush3.bf16.msra.mxu1 %v2321_v22 }
 0x2b2   :  { %2146 = vmatprep.subr.bf16.mxu1 %v2182_v9 }
 0x2b3   :  { %2166 = vmatpush3.bf16.msra.mxu0 %v2309_v19 }
 0x2b4   :  { %2167 = vmatprep.subr.bf16.mxu0 %v2182_v9 }
 0x2b5   :  { %2148 = vmatpush3.bf16.msra.mxu1 %v2333_v25 }
 0x2b6   :  { %2149 = vmatprep.subr.bf16.mxu1 %v2182_v9 }
 0x2b7   :  { %2169 = vmatpush3.bf16.msra.mxu0 %v2321_v22 }
 0x2b8   :  { %2170 = vmatprep.subr.bf16.mxu0 %v2182_v9 }
 0x2b9   :  { %2151 = vmatpush3.bf16.msra.mxu1 %v2348_v28 }
 0x2bb   :  { %2172 = vmatpush3.bf16.msra.mxu0 %v2333_v25 }
 0x2bc   :  { %2173 = vmatprep.subr.bf16.mxu0 %v2182_v9 }
 0x2bf   :  { %2175 = vmatpush3.bf16.msra.mxu0 %v2348_v28 }
 0x36b   :  { %v889_v1 = vpop.f32.mrb[10].mxu1 }
 0x36c   :  { %v890_v7 = vadd.f32 %v2434_v46, %v889_v1  ;;  %v1863_v13 = vpop.f32.mrb[11].mxu1 }
 0x36e   :  { %v894_v16 = vadd.f32 %v893_v10, %v890_v7 }
 0x36f   :  { %v1150_v19 = vpop.f32.mrb[12].mxu1 }
 0x370   :  { %v896_v62 = vsub.f32 %v894_v16, %v1469_v56  ;;  %v1151_v22 = vadd.f32 %v2357_v29, %v1150_v19  ;;  %v1908_v2 = vpop.f32.mrb[13].mxu1 }
 0x371   :  { %v1058_v3 = vpop.f32.mrb[10].mxu0 }
 0x372   :  { %1481 = vst [vmem:[%s2677_s8 + $0x20] sm:$0xff] %v896_v62  ;;  %v1155_v9 = vadd.f32 %v1154_v63, %v1151_v22  ;;  %vm897_vm13 = vcmp.gt.f32.partialorder %v896_v62, 1.0  ;;  %v1059_v25 = vadd.f32 %v2434_v46, %v1058_v3  ;;  %v1062_v28 = vmul.f32 0.5, %v896_v62  ;;  %v1903_v4 = vpop.f32.mrb[11].mxu0 }
 0x373   :  { %v1479_v5 = vsel %vm897_vm13, 1.0, %v2180_v0 }
 0x374   :  { %v1157_v6 = vsub.f32 %v1155_v9, %v1485_v59  ;;  %v905_v8 = vpack.c.bf16 %v1479_v5, %v1479_v5  ;;  %v1063_v11 = vadd.f32 %v1062_v28, %v1059_v25 }
 0x375   :  { %v1319_v12 = vpop.f32.mrb[12].mxu0 }
 0x376   :  { %1498 = vst [vmem:[%s2674_s6 + $0x30] sm:$0xff] %v1157_v6  ;;  %1480 = vst [vmem:[%s2678_s7 + $0x10] sm:$0xf] %v905_v8  ;;  %v1065_v14 = vsub.f32 %v1063_v11, %v1479_v5  ;;  %vm1158_vm14 = vcmp.gt.f32.partialorder %v1157_v6, 1.0  ;;  %v1320_v15 = vadd.f32 %v2357_v29, %v1319_v12  ;;  %v1323_v17 = vmul.f32 0.5, %v1157_v6  ;;  %v1948_v18 = vpop.f32.mrb[13].mxu0 }
 0x377   :  { %v1495_v20 = vsel %vm1158_vm14, 1.0, %v2180_v0  ;;  %1942 = vmatmul.mubr.msk.f32.vlgmr.msra.gmra.mrb[14].mxu1 %vm1158_vm14, %v2183_v38 }
 0x378   :  { %1491 = vst [vmem:[%s2677_s8 + $0x28] sm:$0xff] %v1065_v14  ;;  %v1236_v21 = vpack.c.bf16 %v1495_v20, %v1495_v20  ;;  %v1324_v23 = vadd.f32 %v1323_v17, %v1320_v15  ;;  %vm1066_vm15 = vcmp.gt.f32.partialorder %v1065_v14, 1.0  ;;  %v1231_v33 = vmul.f32 0.5, %v1065_v14 }
 0x379   :  { %v1489_v24 = vsel %vm1066_vm15, 1.0, %v2180_v0 }
 0x37a   :  { %1497 = vst [vmem:[%s2675_s5 + $0x18] sm:$0xf] %v1236_v21  ;;  %v1326_v29 = vsub.f32 %v1324_v23, %v1495_v20  ;;  %v1074_v26 = vpack.c.bf16 %v1489_v24, %v1489_v24 }
 0x37c   :  { %1508 = vst [vmem:[%s2674_s6 + $0x38] sm:$0xff] %v1326_v29  ;;  %vm1327_vm0 = vcmp.gt.f32.partialorder %v1326_v29, 1.0  ;;  %1490 = vst [vmem:[%s2678_s7 + $0x14] sm:$0xf] %v1074_v26 }
 0x37d   :  { %v1505_v27 = vsel %vm1327_vm0, 1.0, %v2180_v0  ;;  %1982 = vmatmul.mubr.msk.f32.vlgmr.msra.gmra.mrb[14].mxu0 %vm1327_vm0, %v2183_v38 }
 0x37e   :  { %v1405_v30 = vpack.c.bf16 %v1505_v27, %v1505_v27 }
 0x380   :  { %1507 = vst [vmem:[%s2675_s5 + $0x1c] sm:$0xf] %v1405_v30 }
 0x44a   :  { %v1227_v31 = vpop.f32.mrb[14].mxu1 }
 0x44b   :  { %v1228_v32 = vadd.f32 %v2434_v46, %v1227_v31  ;;  %v1943_v34 = vpop.f32.mrb[15].mxu1 }
 0x44d   :  { %v1232_v35 = vadd.f32 %v1231_v33, %v1228_v32 }
 0x44f   :  { %v1234_v36 = vsub.f32 %v1232_v35, %v1489_v24 }
 0x450   :  { %v1396_v37 = vpop.f32.mrb[14].mxu0 }
 0x451   :  { %1501 = vst [vmem:[%s2677_s8 + $0x30] sm:$0xff] %v1234_v36  ;;  %vm1235_vm1 = vcmp.gt.f32.partialorder %v1234_v36, 1.0  ;;  %v1397_v38 = vadd.f32 %v2434_v46, %v1396_v37  ;;  %v1400_v39 = vmul.f32 0.5, %v1234_v36  ;;  %v1983_v40 = vpop.f32.mrb[15].mxu0 }
 0x452   :  { %v1499_v41 = vsel %vm1235_vm1, 1.0, %v2180_v0 }
 0x453   :  { %v1243_v42 = vpack.c.bf16 %v1499_v41, %v1499_v41  ;;  %v1401_v43 = vadd.f32 %v1400_v39, %v1397_v38 }
 0x455   :  { %1500 = vst [vmem:[%s2678_s7 + $0x18] sm:$0xf] %v1243_v42  ;;  %v1403_v44 = vsub.f32 %v1401_v43, %v1499_v41 }
 0x457   :  { %vm1404_vm2 = vcmp.gt.f32.partialorder %v1403_v44, 1.0  ;;  %1511 = vst [vmem:[%s2677_s8 + $0x38] sm:$0xff] %v1403_v44 }
 0x458   :  { %v1509_v45 = vsel %vm1404_vm2, 1.0, %v2180_v0 }
 0x459   :  { %v1412_v47 = vpack.c.bf16 %v1509_v45, %v1509_v45 }
 0x45b   :  { %1510 = vst [vmem:[%s2678_s7 + $0x1c] sm:$0xf] %v1412_v47 }

</bundles_post_ra>
